<compile_context>
chip_gen: v7x
topology: tpu7x:2x2x1
jax: 0.10.0
libtpu: 0.0.40
codegen_flags: <defaults>
</compile_context>

<pallas_src>
import functools

import jax
import jax.numpy as jnp
from jax.experimental import pallas as pl
from jax.experimental.pallas import tpu as pltpu


# ----------------------------------------------------------------------------
# Pallas kernel: tiled GEMM + bias + optional LeakyReLU.
# bf16 operands on the MXU, f32 accumulation in VMEM scratch.
# ----------------------------------------------------------------------------
def _gemm_bias_act_kernel(x_ref, w_ref, b_ref, o_ref, acc_ref, *, apply_act,
                          neg_slope):
    @pl.when(pl.program_id(2) == 0)
    def _():
        acc_ref[...] = jnp.zeros_like(acc_ref)

    acc_ref[...] += jnp.dot(x_ref[...], w_ref[...],
                            preferred_element_type=jnp.float32)

    @pl.when(pl.program_id(2) == pl.num_programs(2) - 1)
    def _():
        r = acc_ref[...] + b_ref[...]            # f32 bias add
        if apply_act:
            r = jnp.where(r >= 0, r, neg_slope * r)
        o_ref[...] = r.astype(o_ref.dtype)


def _round_up(x, m):
    return (x + m - 1) // m * m


def _largest_div_tile(p, cap):
    """Largest multiple of 128 that divides `p` (a multiple of 128), <= cap."""
    cap = max(128, cap)
    n = p // 128
    best = 1
    for d in range(1, n + 1):
        if n % d == 0 and d * 128 <= cap:
            best = d
    return best * 128


_VMEM_PIPE_BUDGET = 20 * 1024 * 1024   # double-buffered tiles + scratch
_VMEM_LIMIT = 32 * 1024 * 1024         # scoped limit safe on v5e/v6e/v7x


def _pick_tiles(M, Kp, Np):
    """Shape-aware tile selection. Kp, Np are multiples of 128 (pre-padded)."""
    tn = _largest_div_tile(Np, 512)
    if M <= 128:
        # Tiny M (e.g. the fc batch): sublane-align only, do NOT pad to 128.
        tm = _round_up(max(M, 1), 16)
        mp = tm
    else:
        mp = _round_up(M, 128)
        # Keep >= 2 row blocks so both v7x TensorCores get work.
        cap_m = max(128, min(512, (mp // 2) // 128 * 128))
        tm = _largest_div_tile(mp, cap_m)
    # K tile: as large as the VMEM pipeline budget allows (bf16 x/w tiles,
    # double-buffered) -> far fewer grid steps / per-step overhead.
    fixed = 12 * tm * tn + 8 * tn + 4096          # out (2x) + f32 acc + bias
    avail = max(_VMEM_PIPE_BUDGET - fixed, 4 * 128 * (tm + tn))
    tk_cap = max(128, avail // (4 * (tm + tn)))
    tk = _largest_div_tile(Kp, tk_cap)
    return tm, tk, tn, mp


def gemm_bias_act(x, w, b, n_out, *, apply_act, out_dtype, neg_slope=0.01):
    """out[M, n_out] = act(x[M, K] @ w + b) with w (Kp, Np) and b (1, Np)
    pre-padded (zeros) to 128 multiples."""
    M, K = x.shape
    Kp, Np = w.shape
    assert K <= Kp and n_out <= Np

    tm, tk, tn, Mp = _pick_tiles(M, Kp, Np)

    xp = x.astype(jnp.bfloat16)
    if (Mp, Kp) != (M, K):
        xp = jnp.pad(xp, ((0, Mp - M), (0, Kp - K)))

    kernel = functools.partial(_gemm_bias_act_kernel, apply_act=apply_act,
                               neg_slope=neg_slope)
    out = pl.pallas_call(
        kernel,
        out_shape=jax.ShapeDtypeStruct((Mp, Np), out_dtype),
        grid_spec=pltpu.PrefetchScalarGridSpec(
            num_scalar_prefetch=0,
            grid=(Mp // tm, Np // tn, Kp // tk),
            in_specs=[
                pl.BlockSpec((tm, tk), lambda i, j, k: (i, k)),
                pl.BlockSpec((tk, tn), lambda i, j, k: (k, j)),
                pl.BlockSpec((1, tn), lambda i, j, k: (0, j)),
            ],
            out_specs=pl.BlockSpec((tm, tn), lambda i, j, k: (i, j)),
            scratch_shapes=[pltpu.VMEM((tm, tn), jnp.float32)],
        ),
        compiler_params=pltpu.CompilerParams(
            dimension_semantics=("parallel", "parallel", "arbitrary"),
            vmem_limit_bytes=_VMEM_LIMIT),
    )(xp, w, b)
    return out[:M, :n_out]


# ----------------------------------------------------------------------------
# Glue: im2col patch extraction in bf16 (halves the patch HBM footprint).
# TODO(synk): fuse the patch extraction into the GEMM kernel (pl.ANY input +
# manual strided DMA) to remove the remaining k*k patch expansion in HBM.
# ----------------------------------------------------------------------------
def _im2col(x_nhwc, ksize, stride, pad):
    B, H, W, C = x_nhwc.shape
    OH = (H + 2 * pad - ksize) // stride + 1
    OW = (W + 2 * pad - ksize) // stride + 1
    xp = jnp.pad(x_nhwc, ((0, 0), (pad, pad), (pad, pad), (0, 0)))
    cols = []
    for dh in range(ksize):
        for dw in range(ksize):
            cols.append(jax.lax.slice(
                xp,
                (0, dh, dw, 0),
                (B, dh + (OH - 1) * stride + 1, dw + (OW - 1) * stride + 1, C),
                (1, stride, stride, 1)))
    patches = jnp.stack(cols, axis=3)                 # (B, OH, OW, k*k, C)
    return patches.reshape(B * OH * OW, ksize * ksize * C), OH, OW


def conv2d_leaky(x_nhwc, w_kpnp, b_np, out_channels, *, ksize=5, stride=2,
                 pad=2):
    """Conv2d(k=5, s=2, p=2) + bias + LeakyReLU(0.01). Dropout = identity."""
    B = x_nhwc.shape[0]
    patches, OH, OW = _im2col(x_nhwc, ksize, stride, pad)
    out = gemm_bias_act(patches, w_kpnp, b_np, out_channels,
                        apply_act=True, out_dtype=jnp.bfloat16)
    return out.reshape(B, OH, OW, out_channels)


# ----------------------------------------------------------------------------
# Encoder forward
# ----------------------------------------------------------------------------
@functools.partial(jax.jit, static_argnames=("conv_oc", "latent_dim"))
def encoder_forward(params, x_nchw, *, conv_oc, latent_dim):
    # NCHW -> NHWC for the conv stack; activations travel in bf16.
    x = jnp.transpose(x_nchw, (0, 2, 3, 1)).astype(jnp.bfloat16)
    for i, oc in enumerate(conv_oc):
        x = conv2d_leaky(x, params[f"conv{i}_w"], params[f"conv{i}_b"], oc)
    B = x.shape[0]
    flat = x.reshape(B, -1)     # NHWC flatten; fc weight pre-permuted to match
    return gemm_bias_act(flat, params["fc_w"], params["fc_b"], latent_dim,
                         apply_act=False, out_dtype=jnp.float32)


# ----------------------------------------------------------------------------
# Parameter init (PyTorch layout) + one-time layout/pad/cast preparation
# ----------------------------------------------------------------------------
def init_raw_params(key, *, num_filters, latent_dim, image_size):
    chans = [3, num_filters, 2 * num_filters, 4 * num_filters,
             8 * num_filters]
    keys = jax.random.split(key, 10)
    raw = {}
    for i in range(4):
        ic, oc = chans[i], chans[i + 1]
        raw[f"conv{i}_w"] = 0.05 * jax.random.normal(
            keys[2 * i], (oc, ic, 5, 5), dtype=jnp.float32)
        raw[f"conv{i}_b"] = 0.01 * jax.random.normal(
            keys[2 * i + 1], (oc,), dtype=jnp.float32)
    spatial = image_size // 16  # four stride-2 convs
    in_features = chans[-1] * spatial * spatial
    raw["fc_w"] = 0.05 * jax.random.normal(
        keys[8], (latent_dim, in_features), dtype=jnp.float32)
    raw["fc_b"] = 0.01 * jax.random.normal(
        keys[9], (latent_dim,), dtype=jnp.float32)
    return raw


def prepare_params(raw, *, image_size):
    """One-time weight layout / pad / cast (outside the per-forward path)."""
    prep = {}
    for i in range(4):
        w = raw[f"conv{i}_w"]                        # (OC, IC, KH, KW)
        oc, ic, kh, kw = w.shape
        # patch column order is (kh, kw, ic) -> matching weight matrix.
        wm = jnp.transpose(w, (2, 3, 1, 0)).reshape(kh * kw * ic, oc)
        kp, np_ = _round_up(wm.shape[0], 128), _round_up(oc, 128)
        prep[f"conv{i}_w"] = jnp.pad(
            wm, ((0, kp - wm.shape[0]), (0, np_ - oc))).astype(jnp.bfloat16)
        prep[f"conv{i}_b"] = jnp.pad(
            raw[f"conv{i}_b"].reshape(1, -1),
            ((0, 0), (0, np_ - oc))).astype(jnp.float32)

    fc_w, fc_b = raw["fc_w"], raw["fc_b"]
    latent, in_features = fc_w.shape
    hs = ws = image_size // 16
    c_last = raw["conv3_w"].shape[0]
    assert in_features == c_last * hs * ws
    # Re-order the fc input axis from PyTorch's (C, H, W) flatten order to the
    # (H, W, C) order produced by the NHWC conv output, so no per-forward
    # activation transpose is needed.
    fc_hwc = fc_w.reshape(latent, c_last, hs, ws).transpose(0, 2, 3, 1)
    w_mat = fc_hwc.reshape(latent, in_features).T          # (K, latent)
    kp, np_ = _round_up(in_features, 128), _round_up(latent, 128)
    prep["fc_w"] = jnp.pad(
        w_mat, ((0, kp - in_features), (0, np_ - latent))).astype(jnp.bfloat16)
    prep["fc_b"] = jnp.pad(
        fc_b.reshape(1, -1), ((0, 0), (0, np_ - latent))).astype(jnp.float32)
    return prep


# ----------------------------------------------------------------------------
# Pure-JAX f32 reference (matches the PyTorch forward in eval mode)
# ----------------------------------------------------------------------------
def encoder_reference(raw, x_nchw):
    x = x_nchw
    for i in range(4):
        w = raw[f"conv{i}_w"]
        b = raw[f"conv{i}_b"]
        x = jax.lax.conv_general_dilated(
            x, w, window_strides=(2, 2), padding=((2, 2), (2, 2)),
            dimension_numbers=("NCHW", "OIHW", "NCHW"))
        x = x + b.reshape(1, -1, 1, 1)
        x = jnp.where(x >= 0, x, 0.01 * x)           # LeakyReLU(0.01)
    flat = x.reshape(x.shape[0], -1)                 # NCHW flatten order
    return flat @ raw["fc_w"].T + raw["fc_b"]


if __name__ == "__main__":
    # Small shapes consistent with the module structure:
    # 4x (conv k5 s2 p2) halves spatial each time, then Linear on the flatten.
    # (The reference hardcodes Linear(18432, latent) which implies 96x96 input
    #  with num_filters=64; here scaled down: 32x32 input, num_filters=8.)
    batch, image_size = 2, 32
    num_filters, latent_dim = 8, 16
    conv_oc = (num_filters, 2 * num_filters, 4 * num_filters, 8 * num_filters)

    key = jax.random.PRNGKey(0)
    pkey, xkey = jax.random.split(key)
    raw = init_raw_params(pkey, num_filters=num_filters,
                          latent_dim=latent_dim, image_size=image_size)
    params = prepare_params(raw, image_size=image_size)
    x = jax.random.normal(xkey, (batch, 3, image_size, image_size),
                          dtype=jnp.float32)

    out = encoder_forward(params, x, conv_oc=conv_oc, latent_dim=latent_dim)
    out = jax.block_until_ready(out)
    assert out.shape == (batch, latent_dim), out.shape
    assert bool(jnp.all(jnp.isfinite(out)))

    # Loose correctness check vs f32 reference (bf16 activations/weights in
    # the Pallas path -> small relative error is expected).
    ref = jax.block_until_ready(encoder_reference(raw, x))
    rel = float(jnp.linalg.norm(out - ref) / (jnp.linalg.norm(ref) + 1e-6))
    assert rel < 5e-2, f"relative error too large: {rel}"

    print("KERNEL_OK")
</pallas_src>

<mosaic_0001>
module attributes {stable_mosaic.version = 11 : i64} {
  func.func @_gemm_bias_act_kernel(%arg0: i32, %arg1: i32, %arg2: i32, %arg3: memref<256x128xbf16, #tpu.memory_space<vmem>>, %arg4: memref<128x128xbf16, #tpu.memory_space<vmem>>, %arg5: memref<1x128xf32, #tpu.memory_space<vmem>>, %arg6: memref<256x128xbf16, #tpu.memory_space<vmem>>, %arg7: memref<256x128xf32, #tpu.memory_space<vmem>>) attributes {dimension_semantics = [#tpu.dimension_semantics<parallel>, #tpu.dimension_semantics<parallel>, #tpu.dimension_semantics<arbitrary>], iteration_bounds = array<i64: 2, 1, 1>, scalar_prefetch = 0 : i64, scratch_operands = 1 : i64, tpu.core_type = #tpu.core_type<tc>, window_params = [{transform_indices = @transform_0, window_bounds = array<i64: 256, 128>}, {transform_indices = @transform_1, window_bounds = array<i64: 128, 128>}, {transform_indices = @transform_2, window_bounds = array<i64: 1, 128>}, {transform_indices = @transform_3, window_bounds = array<i64: 256, 128>}]} {
    %c0_i32 = arith.constant 0 : i32
    %0 = arith.cmpi eq, %arg2, %c0_i32 : i32
    %1 = arith.extui %0 : i1 to i32
    %c0_i32_0 = arith.constant 0 : i32
    %2 = arith.cmpi ne, %1, %c0_i32_0 : i32
    scf.if %2 {
      %cst_10 = arith.constant 0.000000e+00 : f32
      %12 = vector.broadcast %cst_10 : f32 to vector<256x128xf32>
      %c0_11 = arith.constant 0 : index
      %c0_12 = arith.constant 0 : index
      %13 = vector.load %arg7[%c0_11, %c0_12] : memref<256x128xf32, #tpu.memory_space<vmem>>, vector<256x128xf32>
      tpu.vector_store %arg7[%c0_11, %c0_12], %12 {strides = array<i32>} : memref<256x128xf32, #tpu.memory_space<vmem>>, vector<256x128xf32>,
    } else {
    }
    %c0 = arith.constant 0 : index
    %c0_1 = arith.constant 0 : index
    %3 = vector.load %arg7[%c0, %c0_1] : memref<256x128xf32, #tpu.memory_space<vmem>>, vector<256x128xf32>
    %c0_2 = arith.constant 0 : index
    %c0_3 = arith.constant 0 : index
    %4 = vector.load %arg3[%c0_2, %c0_3] : memref<256x128xbf16, #tpu.memory_space<vmem>>, vector<256x128xbf16>
    %c0_4 = arith.constant 0 : index
    %c0_5 = arith.constant 0 : index
    %5 = vector.load %arg4[%c0_4, %c0_5] : memref<128x128xbf16, #tpu.memory_space<vmem>>, vector<128x128xbf16>
    %cst = arith.constant dense<0.000000e+00> : vector<256x128xf32>
    %6 = tpu.matmul %4, %5, %cst {dimension_numbers = #tpu.dot_dimension_numbers<[1], [0], [0], [1], [0, 0, 1, 1], [], []>} : vector<256x128xbf16>, vector<128x128xbf16>, vector<256x128xf32> -> vector<256x128xf32>
    %7 = arith.addf %3, %6 : vector<256x128xf32>
    %c0_6 = arith.constant 0 : index
    %c0_7 = arith.constant 0 : index
    %8 = vector.load %arg7[%c0_6, %c0_7] : memref<256x128xf32, #tpu.memory_space<vmem>>, vector<256x128xf32>
    tpu.vector_store %arg7[%c0_6, %c0_7], %7 {strides = array<i32>} : memref<256x128xf32, #tpu.memory_space<vmem>>, vector<256x128xf32>,
    %c0_i32_8 = arith.constant 0 : i32
    %9 = arith.cmpi eq, %arg2, %c0_i32_8 : i32
    %10 = arith.extui %9 : i1 to i32
    %c0_i32_9 = arith.constant 0 : i32
    %11 = arith.cmpi ne, %10, %c0_i32_9 : i32
    scf.if %11 {
      %c0_10 = arith.constant 0 : index
      %c0_11 = arith.constant 0 : index
      %12 = vector.load %arg7[%c0_10, %c0_11] : memref<256x128xf32, #tpu.memory_space<vmem>>, vector<256x128xf32>
      %c0_12 = arith.constant 0 : index
      %c0_13 = arith.constant 0 : index
      %13 = vector.load %arg5[%c0_12, %c0_13] : memref<1x128xf32, #tpu.memory_space<vmem>>, vector<1x128xf32>
      %14 = vector.broadcast %13 : vector<1x128xf32> to vector<256x128xf32>
      %15 = arith.addf %12, %14 : vector<256x128xf32>
      %cst_14 = arith.constant 0.000000e+00 : f32
      %16 = vector.broadcast %cst_14 : f32 to vector<256x128xf32>
      %17 = arith.cmpf oge, %15, %16 : vector<256x128xf32>
      %cst_15 = arith.constant 0.00999999977 : f32
      %18 = vector.broadcast %cst_15 : f32 to vector<256x128xf32>
      %19 = arith.mulf %18, %15 : vector<256x128xf32>
      %20 = arith.select %17, %15, %19 : vector<256x128xi1>, vector<256x128xf32>
      %21 = arith.truncf %20 : vector<256x128xf32> to vector<256x128xbf16>
      %c0_16 = arith.constant 0 : index
      %c0_17 = arith.constant 0 : index
      %22 = vector.load %arg6[%c0_16, %c0_17] : memref<256x128xbf16, #tpu.memory_space<vmem>>, vector<256x128xbf16>
      tpu.vector_store %arg6[%c0_16, %c0_17], %21 {strides = array<i32>} : memref<256x128xbf16, #tpu.memory_space<vmem>>, vector<256x128xbf16>,
    } else {
    }
    return
  }
  func.func @transform_0(%arg0: i32, %arg1: i32, %arg2: i32) -> (i32, i32) {
    %c0_i32 = arith.constant 0 : i32
    return %arg0, %arg2 : i32, i32
  }
  func.func @transform_1(%arg0: i32, %arg1: i32, %arg2: i32) -> (i32, i32) {
    %c0_i32 = arith.constant 0 : i32
    return %arg2, %arg1 : i32, i32
  }
  func.func @transform_2(%arg0: i32, %arg1: i32, %arg2: i32) -> (i32, i32) {
    %c0_i32 = arith.constant 0 : i32
    %c0_i32_0 = arith.constant 0 : i32
    return %c0_i32, %arg1 : i32, i32
  }
  func.func @transform_3(%arg0: i32, %arg1: i32, %arg2: i32) -> (i32, i32) {
    %c0_i32 = arith.constant 0 : i32
    return %arg0, %arg1 : i32, i32
  }
}

module attributes {stable_mosaic.version = 11 : i64} {
  func.func @_gemm_bias_act_kernel(%arg0: i32, %arg1: i32, %arg2: i32, %arg3: memref<128x256xbf16, #tpu.memory_space<vmem>>, %arg4: memref<256x128xbf16, #tpu.memory_space<vmem>>, %arg5: memref<1x128xf32, #tpu.memory_space<vmem>>, %arg6: memref<128x128xbf16, #tpu.memory_space<vmem>>, %arg7: memref<128x128xf32, #tpu.memory_space<vmem>>) attributes {dimension_semantics = [#tpu.dimension_semantics<parallel>, #tpu.dimension_semantics<parallel>, #tpu.dimension_semantics<arbitrary>], iteration_bounds = array<i64: 1, 1, 1>, scalar_prefetch = 0 : i64, scratch_operands = 1 : i64, tpu.core_type = #tpu.core_type<tc>, window_params = [{transform_indices = @transform_0, window_bounds = array<i64: 128, 256>}, {transform_indices = @transform_1, window_bounds = array<i64: 256, 128>}, {transform_indices = @transform_2, window_bounds = array<i64: 1, 128>}, {transform_indices = @transform_3, window_bounds = array<i64: 128, 128>}]} {
    %c0_i32 = arith.constant 0 : i32
    %0 = arith.cmpi eq, %arg2, %c0_i32 : i32
    %1 = arith.extui %0 : i1 to i32
    %c0_i32_0 = arith.constant 0 : i32
    %2 = arith.cmpi ne, %1, %c0_i32_0 : i32
    scf.if %2 {
      %cst_10 = arith.constant 0.000000e+00 : f32
      %12 = vector.broadcast %cst_10 : f32 to vector<128x128xf32>
      %c0_11 = arith.constant 0 : index
      %c0_12 = arith.constant 0 : index
      %13 = vector.load %arg7[%c0_11, %c0_12] : memref<128x128xf32, #tpu.memory_space<vmem>>, vector<128x128xf32>
      tpu.vector_store %arg7[%c0_11, %c0_12], %12 {strides = array<i32>} : memref<128x128xf32, #tpu.memory_space<vmem>>, vector<128x128xf32>,
    } else {
    }
    %c0 = arith.constant 0 : index
    %c0_1 = arith.constant 0 : index
    %3 = vector.load %arg7[%c0, %c0_1] : memref<128x128xf32, #tpu.memory_space<vmem>>, vector<128x128xf32>
    %c0_2 = arith.constant 0 : index
    %c0_3 = arith.constant 0 : index
    %4 = vector.load %arg3[%c0_2, %c0_3] : memref<128x256xbf16, #tpu.memory_space<vmem>>, vector<128x256xbf16>
    %c0_4 = arith.constant 0 : index
    %c0_5 = arith.constant 0 : index
    %5 = vector.load %arg4[%c0_4, %c0_5] : memref<256x128xbf16, #tpu.memory_space<vmem>>, vector<256x128xbf16>
    %cst = arith.constant dense<0.000000e+00> : vector<128x128xf32>
    %6 = tpu.matmul %4, %5, %cst {dimension_numbers = #tpu.dot_dimension_numbers<[1], [0], [0], [1], [0, 0, 1, 1], [], []>} : vector<128x256xbf16>, vector<256x128xbf16>, vector<128x128xf32> -> vector<128x128xf32>
    %7 = arith.addf %3, %6 : vector<128x128xf32>
    %c0_6 = arith.constant 0 : index
    %c0_7 = arith.constant 0 : index
    %8 = vector.load %arg7[%c0_6, %c0_7] : memref<128x128xf32, #tpu.memory_space<vmem>>, vector<128x128xf32>
    tpu.vector_store %arg7[%c0_6, %c0_7], %7 {strides = array<i32>} : memref<128x128xf32, #tpu.memory_space<vmem>>, vector<128x128xf32>,
    %c0_i32_8 = arith.constant 0 : i32
    %9 = arith.cmpi eq, %arg2, %c0_i32_8 : i32
    %10 = arith.extui %9 : i1 to i32
    %c0_i32_9 = arith.constant 0 : i32
    %11 = arith.cmpi ne, %10, %c0_i32_9 : i32
    scf.if %11 {
      %c0_10 = arith.constant 0 : index
      %c0_11 = arith.constant 0 : index
      %12 = vector.load %arg7[%c0_10, %c0_11] : memref<128x128xf32, #tpu.memory_space<vmem>>, vector<128x128xf32>
      %c0_12 = arith.constant 0 : index
      %c0_13 = arith.constant 0 : index
      %13 = vector.load %arg5[%c0_12, %c0_13] : memref<1x128xf32, #tpu.memory_space<vmem>>, vector<1x128xf32>
      %14 = vector.broadcast %13 : vector<1x128xf32> to vector<128x128xf32>
      %15 = arith.addf %12, %14 : vector<128x128xf32>
      %cst_14 = arith.constant 0.000000e+00 : f32
      %16 = vector.broadcast %cst_14 : f32 to vector<128x128xf32>
      %17 = arith.cmpf oge, %15, %16 : vector<128x128xf32>
      %cst_15 = arith.constant 0.00999999977 : f32
      %18 = vector.broadcast %cst_15 : f32 to vector<128x128xf32>
      %19 = arith.mulf %18, %15 : vector<128x128xf32>
      %20 = arith.select %17, %15, %19 : vector<128x128xi1>, vector<128x128xf32>
      %21 = arith.truncf %20 : vector<128x128xf32> to vector<128x128xbf16>
      %c0_16 = arith.constant 0 : index
      %c0_17 = arith.constant 0 : index
      %22 = vector.load %arg6[%c0_16, %c0_17] : memref<128x128xbf16, #tpu.memory_space<vmem>>, vector<128x128xbf16>
      tpu.vector_store %arg6[%c0_16, %c0_17], %21 {strides = array<i32>} : memref<128x128xbf16, #tpu.memory_space<vmem>>, vector<128x128xbf16>,
    } else {
    }
    return
  }
  func.func @transform_0(%arg0: i32, %arg1: i32, %arg2: i32) -> (i32, i32) {
    %c0_i32 = arith.constant 0 : i32
    return %arg0, %arg2 : i32, i32
  }
  func.func @transform_1(%arg0: i32, %arg1: i32, %arg2: i32) -> (i32, i32) {
    %c0_i32 = arith.constant 0 : i32
    return %arg2, %arg1 : i32, i32
  }
  func.func @transform_2(%arg0: i32, %arg1: i32, %arg2: i32) -> (i32, i32) {
    %c0_i32 = arith.constant 0 : i32
    %c0_i32_0 = arith.constant 0 : i32
    return %c0_i32, %arg1 : i32, i32
  }
  func.func @transform_3(%arg0: i32, %arg1: i32, %arg2: i32) -> (i32, i32) {
    %c0_i32 = arith.constant 0 : i32
    return %arg0, %arg1 : i32, i32
  }
}

module attributes {stable_mosaic.version = 11 : i64} {
  func.func @_gemm_bias_act_kernel(%arg0: i32, %arg1: i32, %arg2: i32, %arg3: memref<32x512xbf16, #tpu.memory_space<vmem>>, %arg4: memref<512x128xbf16, #tpu.memory_space<vmem>>, %arg5: memref<1x128xf32, #tpu.memory_space<vmem>>, %arg6: memref<32x128xbf16, #tpu.memory_space<vmem>>, %arg7: memref<32x128xf32, #tpu.memory_space<vmem>>) attributes {dimension_semantics = [#tpu.dimension_semantics<parallel>, #tpu.dimension_semantics<parallel>, #tpu.dimension_semantics<arbitrary>], iteration_bounds = array<i64: 1, 1, 1>, scalar_prefetch = 0 : i64, scratch_operands = 1 : i64, tpu.core_type = #tpu.core_type<tc>, window_params = [{transform_indices = @transform_0, window_bounds = array<i64: 32, 512>}, {transform_indices = @transform_1, window_bounds = array<i64: 512, 128>}, {transform_indices = @transform_2, window_bounds = array<i64: 1, 128>}, {transform_indices = @transform_3, window_bounds = array<i64: 32, 128>}]} {
    %c0_i32 = arith.constant 0 : i32
    %0 = arith.cmpi eq, %arg2, %c0_i32 : i32
    %1 = arith.extui %0 : i1 to i32
    %c0_i32_0 = arith.constant 0 : i32
    %2 = arith.cmpi ne, %1, %c0_i32_0 : i32
    scf.if %2 {
      %cst_10 = arith.constant 0.000000e+00 : f32
      %12 = vector.broadcast %cst_10 : f32 to vector<32x128xf32>
      %c0_11 = arith.constant 0 : index
      %c0_12 = arith.constant 0 : index
      %13 = vector.load %arg7[%c0_11, %c0_12] : memref<32x128xf32, #tpu.memory_space<vmem>>, vector<32x128xf32>
      tpu.vector_store %arg7[%c0_11, %c0_12], %12 {strides = array<i32>} : memref<32x128xf32, #tpu.memory_space<vmem>>, vector<32x128xf32>,
    } else {
    }
    %c0 = arith.constant 0 : index
    %c0_1 = arith.constant 0 : index
    %3 = vector.load %arg7[%c0, %c0_1] : memref<32x128xf32, #tpu.memory_space<vmem>>, vector<32x128xf32>
    %c0_2 = arith.constant 0 : index
    %c0_3 = arith.constant 0 : index
    %4 = vector.load %arg3[%c0_2, %c0_3] : memref<32x512xbf16, #tpu.memory_space<vmem>>, vector<32x512xbf16>
    %c0_4 = arith.constant 0 : index
    %c0_5 = arith.constant 0 : index
    %5 = vector.load %arg4[%c0_4, %c0_5] : memref<512x128xbf16, #tpu.memory_space<vmem>>, vector<512x128xbf16>
    %cst = arith.constant dense<0.000000e+00> : vector<32x128xf32>
    %6 = tpu.matmul %4, %5, %cst {dimension_numbers = #tpu.dot_dimension_numbers<[1], [0], [0], [1], [0, 0, 1, 1], [], []>} : vector<32x512xbf16>, vector<512x128xbf16>, vector<32x128xf32> -> vector<32x128xf32>
    %7 = arith.addf %3, %6 : vector<32x128xf32>
    %c0_6 = arith.constant 0 : index
    %c0_7 = arith.constant 0 : index
    %8 = vector.load %arg7[%c0_6, %c0_7] : memref<32x128xf32, #tpu.memory_space<vmem>>, vector<32x128xf32>
    tpu.vector_store %arg7[%c0_6, %c0_7], %7 {strides = array<i32>} : memref<32x128xf32, #tpu.memory_space<vmem>>, vector<32x128xf32>,
    %c0_i32_8 = arith.constant 0 : i32
    %9 = arith.cmpi eq, %arg2, %c0_i32_8 : i32
    %10 = arith.extui %9 : i1 to i32
    %c0_i32_9 = arith.constant 0 : i32
    %11 = arith.cmpi ne, %10, %c0_i32_9 : i32
    scf.if %11 {
      %c0_10 = arith.constant 0 : index
      %c0_11 = arith.constant 0 : index
      %12 = vector.load %arg7[%c0_10, %c0_11] : memref<32x128xf32, #tpu.memory_space<vmem>>, vector<32x128xf32>
      %c0_12 = arith.constant 0 : index
      %c0_13 = arith.constant 0 : index
      %13 = vector.load %arg5[%c0_12, %c0_13] : memref<1x128xf32, #tpu.memory_space<vmem>>, vector<1x128xf32>
      %14 = vector.broadcast %13 : vector<1x128xf32> to vector<32x128xf32>
      %15 = arith.addf %12, %14 : vector<32x128xf32>
      %cst_14 = arith.constant 0.000000e+00 : f32
      %16 = vector.broadcast %cst_14 : f32 to vector<32x128xf32>
      %17 = arith.cmpf oge, %15, %16 : vector<32x128xf32>
      %cst_15 = arith.constant 0.00999999977 : f32
      %18 = vector.broadcast %cst_15 : f32 to vector<32x128xf32>
      %19 = arith.mulf %18, %15 : vector<32x128xf32>
      %20 = arith.select %17, %15, %19 : vector<32x128xi1>, vector<32x128xf32>
      %21 = arith.truncf %20 : vector<32x128xf32> to vector<32x128xbf16>
      %c0_16 = arith.constant 0 : index
      %c0_17 = arith.constant 0 : index
      %22 = vector.load %arg6[%c0_16, %c0_17] : memref<32x128xbf16, #tpu.memory_space<vmem>>, vector<32x128xbf16>
      tpu.vector_store %arg6[%c0_16, %c0_17], %21 {strides = array<i32>} : memref<32x128xbf16, #tpu.memory_space<vmem>>, vector<32x128xbf16>,
    } else {
    }
    return
  }
  func.func @transform_0(%arg0: i32, %arg1: i32, %arg2: i32) -> (i32, i32) {
    %c0_i32 = arith.constant 0 : i32
    return %arg0, %arg2 : i32, i32
  }
  func.func @transform_1(%arg0: i32, %arg1: i32, %arg2: i32) -> (i32, i32) {
    %c0_i32 = arith.constant 0 : i32
    return %arg2, %arg1 : i32, i32
  }
  func.func @transform_2(%arg0: i32, %arg1: i32, %arg2: i32) -> (i32, i32) {
    %c0_i32 = arith.constant 0 : i32
    %c0_i32_0 = arith.constant 0 : i32
    return %c0_i32, %arg1 : i32, i32
  }
  func.func @transform_3(%arg0: i32, %arg1: i32, %arg2: i32) -> (i32, i32) {
    %c0_i32 = arith.constant 0 : i32
    return %arg0, %arg1 : i32, i32
  }
}

module attributes {stable_mosaic.version = 11 : i64} {
  func.func @_gemm_bias_act_kernel(%arg0: i32, %arg1: i32, %arg2: i32, %arg3: memref<16x896xbf16, #tpu.memory_space<vmem>>, %arg4: memref<896x128xbf16, #tpu.memory_space<vmem>>, %arg5: memref<1x128xf32, #tpu.memory_space<vmem>>, %arg6: memref<16x128xbf16, #tpu.memory_space<vmem>>, %arg7: memref<16x128xf32, #tpu.memory_space<vmem>>) attributes {dimension_semantics = [#tpu.dimension_semantics<parallel>, #tpu.dimension_semantics<parallel>, #tpu.dimension_semantics<arbitrary>], iteration_bounds = array<i64: 1, 1, 1>, scalar_prefetch = 0 : i64, scratch_operands = 1 : i64, tpu.core_type = #tpu.core_type<tc>, window_params = [{transform_indices = @transform_0, window_bounds = array<i64: 16, 896>}, {transform_indices = @transform_1, window_bounds = array<i64: 896, 128>}, {transform_indices = @transform_2, window_bounds = array<i64: 1, 128>}, {transform_indices = @transform_3, window_bounds = array<i64: 16, 128>}]} {
    %c0_i32 = arith.constant 0 : i32
    %0 = arith.cmpi eq, %arg2, %c0_i32 : i32
    %1 = arith.extui %0 : i1 to i32
    %c0_i32_0 = arith.constant 0 : i32
    %2 = arith.cmpi ne, %1, %c0_i32_0 : i32
    scf.if %2 {
      %cst_10 = arith.constant 0.000000e+00 : f32
      %12 = vector.broadcast %cst_10 : f32 to vector<16x128xf32>
      %c0_11 = arith.constant 0 : index
      %c0_12 = arith.constant 0 : index
      %13 = vector.load %arg7[%c0_11, %c0_12] : memref<16x128xf32, #tpu.memory_space<vmem>>, vector<16x128xf32>
      tpu.vector_store %arg7[%c0_11, %c0_12], %12 {strides = array<i32>} : memref<16x128xf32, #tpu.memory_space<vmem>>, vector<16x128xf32>,
    } else {
    }
    %c0 = arith.constant 0 : index
    %c0_1 = arith.constant 0 : index
    %3 = vector.load %arg7[%c0, %c0_1] : memref<16x128xf32, #tpu.memory_space<vmem>>, vector<16x128xf32>
    %c0_2 = arith.constant 0 : index
    %c0_3 = arith.constant 0 : index
    %4 = vector.load %arg3[%c0_2, %c0_3] : memref<16x896xbf16, #tpu.memory_space<vmem>>, vector<16x896xbf16>
    %c0_4 = arith.constant 0 : index
    %c0_5 = arith.constant 0 : index
    %5 = vector.load %arg4[%c0_4, %c0_5] : memref<896x128xbf16, #tpu.memory_space<vmem>>, vector<896x128xbf16>
    %cst = arith.constant dense<0.000000e+00> : vector<16x128xf32>
    %6 = tpu.matmul %4, %5, %cst {dimension_numbers = #tpu.dot_dimension_numbers<[1], [0], [0], [1], [0, 0, 1, 1], [], []>} : vector<16x896xbf16>, vector<896x128xbf16>, vector<16x128xf32> -> vector<16x128xf32>
    %7 = arith.addf %3, %6 : vector<16x128xf32>
    %c0_6 = arith.constant 0 : index
    %c0_7 = arith.constant 0 : index
    %8 = vector.load %arg7[%c0_6, %c0_7] : memref<16x128xf32, #tpu.memory_space<vmem>>, vector<16x128xf32>
    tpu.vector_store %arg7[%c0_6, %c0_7], %7 {strides = array<i32>} : memref<16x128xf32, #tpu.memory_space<vmem>>, vector<16x128xf32>,
    %c0_i32_8 = arith.constant 0 : i32
    %9 = arith.cmpi eq, %arg2, %c0_i32_8 : i32
    %10 = arith.extui %9 : i1 to i32
    %c0_i32_9 = arith.constant 0 : i32
    %11 = arith.cmpi ne, %10, %c0_i32_9 : i32
    scf.if %11 {
      %c0_10 = arith.constant 0 : index
      %c0_11 = arith.constant 0 : index
      %12 = vector.load %arg7[%c0_10, %c0_11] : memref<16x128xf32, #tpu.memory_space<vmem>>, vector<16x128xf32>
      %c0_12 = arith.constant 0 : index
      %c0_13 = arith.constant 0 : index
      %13 = vector.load %arg5[%c0_12, %c0_13] : memref<1x128xf32, #tpu.memory_space<vmem>>, vector<1x128xf32>
      %14 = vector.broadcast %13 : vector<1x128xf32> to vector<16x128xf32>
      %15 = arith.addf %12, %14 : vector<16x128xf32>
      %cst_14 = arith.constant 0.000000e+00 : f32
      %16 = vector.broadcast %cst_14 : f32 to vector<16x128xf32>
      %17 = arith.cmpf oge, %15, %16 : vector<16x128xf32>
      %cst_15 = arith.constant 0.00999999977 : f32
      %18 = vector.broadcast %cst_15 : f32 to vector<16x128xf32>
      %19 = arith.mulf %18, %15 : vector<16x128xf32>
      %20 = arith.select %17, %15, %19 : vector<16x128xi1>, vector<16x128xf32>
      %21 = arith.truncf %20 : vector<16x128xf32> to vector<16x128xbf16>
      %c0_16 = arith.constant 0 : index
      %c0_17 = arith.constant 0 : index
      %22 = vector.load %arg6[%c0_16, %c0_17] : memref<16x128xbf16, #tpu.memory_space<vmem>>, vector<16x128xbf16>
      tpu.vector_store %arg6[%c0_16, %c0_17], %21 {strides = array<i32>} : memref<16x128xbf16, #tpu.memory_space<vmem>>, vector<16x128xbf16>,
    } else {
    }
    return
  }
  func.func @transform_0(%arg0: i32, %arg1: i32, %arg2: i32) -> (i32, i32) {
    %c0_i32 = arith.constant 0 : i32
    return %arg0, %arg2 : i32, i32
  }
  func.func @transform_1(%arg0: i32, %arg1: i32, %arg2: i32) -> (i32, i32) {
    %c0_i32 = arith.constant 0 : i32
    return %arg2, %arg1 : i32, i32
  }
  func.func @transform_2(%arg0: i32, %arg1: i32, %arg2: i32) -> (i32, i32) {
    %c0_i32 = arith.constant 0 : i32
    %c0_i32_0 = arith.constant 0 : i32
    return %c0_i32, %arg1 : i32, i32
  }
  func.func @transform_3(%arg0: i32, %arg1: i32, %arg2: i32) -> (i32, i32) {
    %c0_i32 = arith.constant 0 : i32
    return %arg0, %arg1 : i32, i32
  }
}

module attributes {stable_mosaic.version = 11 : i64} {
  func.func @_gemm_bias_act_kernel(%arg0: i32, %arg1: i32, %arg2: i32, %arg3: memref<16x256xbf16, #tpu.memory_space<vmem>>, %arg4: memref<256x128xbf16, #tpu.memory_space<vmem>>, %arg5: memref<1x128xf32, #tpu.memory_space<vmem>>, %arg6: memref<16x128xf32, #tpu.memory_space<vmem>>, %arg7: memref<16x128xf32, #tpu.memory_space<vmem>>) attributes {dimension_semantics = [#tpu.dimension_semantics<parallel>, #tpu.dimension_semantics<parallel>, #tpu.dimension_semantics<arbitrary>], iteration_bounds = array<i64: 1, 1, 1>, scalar_prefetch = 0 : i64, scratch_operands = 1 : i64, tpu.core_type = #tpu.core_type<tc>, window_params = [{transform_indices = @transform_0, window_bounds = array<i64: 16, 256>}, {transform_indices = @transform_1, window_bounds = array<i64: 256, 128>}, {transform_indices = @transform_2, window_bounds = array<i64: 1, 128>}, {transform_indices = @transform_3, window_bounds = array<i64: 16, 128>}]} {
    %c0_i32 = arith.constant 0 : i32
    %0 = arith.cmpi eq, %arg2, %c0_i32 : i32
    %1 = arith.extui %0 : i1 to i32
    %c0_i32_0 = arith.constant 0 : i32
    %2 = arith.cmpi ne, %1, %c0_i32_0 : i32
    scf.if %2 {
      %cst_10 = arith.constant 0.000000e+00 : f32
      %12 = vector.broadcast %cst_10 : f32 to vector<16x128xf32>
      %c0_11 = arith.constant 0 : index
      %c0_12 = arith.constant 0 : index
      %13 = vector.load %arg7[%c0_11, %c0_12] : memref<16x128xf32, #tpu.memory_space<vmem>>, vector<16x128xf32>
      tpu.vector_store %arg7[%c0_11, %c0_12], %12 {strides = array<i32>} : memref<16x128xf32, #tpu.memory_space<vmem>>, vector<16x128xf32>,
    } else {
    }
    %c0 = arith.constant 0 : index
    %c0_1 = arith.constant 0 : index
    %3 = vector.load %arg7[%c0, %c0_1] : memref<16x128xf32, #tpu.memory_space<vmem>>, vector<16x128xf32>
    %c0_2 = arith.constant 0 : index
    %c0_3 = arith.constant 0 : index
    %4 = vector.load %arg3[%c0_2, %c0_3] : memref<16x256xbf16, #tpu.memory_space<vmem>>, vector<16x256xbf16>
    %c0_4 = arith.constant 0 : index
    %c0_5 = arith.constant 0 : index
    %5 = vector.load %arg4[%c0_4, %c0_5] : memref<256x128xbf16, #tpu.memory_space<vmem>>, vector<256x128xbf16>
    %cst = arith.constant dense<0.000000e+00> : vector<16x128xf32>
    %6 = tpu.matmul %4, %5, %cst {dimension_numbers = #tpu.dot_dimension_numbers<[1], [0], [0], [1], [0, 0, 1, 1], [], []>} : vector<16x256xbf16>, vector<256x128xbf16>, vector<16x128xf32> -> vector<16x128xf32>
    %7 = arith.addf %3, %6 : vector<16x128xf32>
    %c0_6 = arith.constant 0 : index
    %c0_7 = arith.constant 0 : index
    %8 = vector.load %arg7[%c0_6, %c0_7] : memref<16x128xf32, #tpu.memory_space<vmem>>, vector<16x128xf32>
    tpu.vector_store %arg7[%c0_6, %c0_7], %7 {strides = array<i32>} : memref<16x128xf32, #tpu.memory_space<vmem>>, vector<16x128xf32>,
    %c0_i32_8 = arith.constant 0 : i32
    %9 = arith.cmpi eq, %arg2, %c0_i32_8 : i32
    %10 = arith.extui %9 : i1 to i32
    %c0_i32_9 = arith.constant 0 : i32
    %11 = arith.cmpi ne, %10, %c0_i32_9 : i32
    scf.if %11 {
      %c0_10 = arith.constant 0 : index
      %c0_11 = arith.constant 0 : index
      %12 = vector.load %arg7[%c0_10, %c0_11] : memref<16x128xf32, #tpu.memory_space<vmem>>, vector<16x128xf32>
      %c0_12 = arith.constant 0 : index
      %c0_13 = arith.constant 0 : index
      %13 = vector.load %arg5[%c0_12, %c0_13] : memref<1x128xf32, #tpu.memory_space<vmem>>, vector<1x128xf32>
      %14 = vector.broadcast %13 : vector<1x128xf32> to vector<16x128xf32>
      %15 = arith.addf %12, %14 : vector<16x128xf32>
      %c0_14 = arith.constant 0 : index
      %c0_15 = arith.constant 0 : index
      %16 = vector.load %arg6[%c0_14, %c0_15] : memref<16x128xf32, #tpu.memory_space<vmem>>, vector<16x128xf32>
      tpu.vector_store %arg6[%c0_14, %c0_15], %15 {strides = array<i32>} : memref<16x128xf32, #tpu.memory_space<vmem>>, vector<16x128xf32>,
    } else {
    }
    return
  }
  func.func @transform_0(%arg0: i32, %arg1: i32, %arg2: i32) -> (i32, i32) {
    %c0_i32 = arith.constant 0 : i32
    return %arg0, %arg2 : i32, i32
  }
  func.func @transform_1(%arg0: i32, %arg1: i32, %arg2: i32) -> (i32, i32) {
    %c0_i32 = arith.constant 0 : i32
    return %arg2, %arg1 : i32, i32
  }
  func.func @transform_2(%arg0: i32, %arg1: i32, %arg2: i32) -> (i32, i32) {
    %c0_i32 = arith.constant 0 : i32
    %c0_i32_0 = arith.constant 0 : i32
    return %c0_i32, %arg1 : i32, i32
  }
  func.func @transform_3(%arg0: i32, %arg1: i32, %arg2: i32) -> (i32, i32) {
    %c0_i32 = arith.constant 0 : i32
    return %arg0, %arg1 : i32, i32
  }
}

</mosaic_0001>

<bundles_post_ra>
// kernel: encoder_forward.5
= control target key start
LH: loop header
LB: loop body
LE: loop exit
PB: predicated region body
PF: predicated region fallthrough
CT: control target
= control target key end

     0   :  { %s1563_s12 = smov 0   ;;  %s1565_s13 = smov 0   ;;  %s1706_s0 = inlined_call_operand.vmem [shape: bf16[512,128], index: 0, kind: input, shape index: {}]   ;;  %s1707_s1 = inlined_call_operand.vmem [shape: bf16[128,128], index: 1, kind: input, shape index: {}]   ;;  %s1708_s2 = inlined_call_operand.vmem [shape: f32[1,128], index: 2, kind: input, shape index: {}]   ;;  %s1709_s3 = inlined_call_operand.vmem [shape: bf16[512,128], index: 3, kind: output, shape index: {}]  }
   0x1   :  { %s1567_s14 = smov 0  }
   0x2 LB: > { %s32_s15 = sadd.s32 1, %s1537_s13  ;;  %p1192_p0 = scmp.ge.s32.totalorder %s1541_s14, 1  ;;  %s1541_s14 = sphi %s1567_s14, %s13_s14   ;;  %s1537_s13 = sphi %s1565_s13, %s1711_s13   ;;  %s1533_s12 = sphi %s1563_s12, %s1710_s12  }
   0x3   : > { %p34_p1 = scmp.ge.s32.totalorder %s32_s15, 2  ;;  %p188_p2 = scmp.lt.s32.totalorder %s1541_s14, 3 }
   0x5   : > { %s1713_s15 = smov (%p34_p1, %s32_s15), 0  ;;  %p189_p3 = pnand %p1192_p0, %p188_p2 }
   0x6   : > { %v1495_v0 = vld [vmem:[%s1707_s1] sm:$0xff] (!%p189_p3)   ;;  %s1193_s18 = sshll.u32 (!%p189_p3), %s1533_s12, 5  ;;  %v1496_v1 = vld [vmem:[%s1707_s1 + $0x8] sm:$0xff] (!%p189_p3)   ;;  %v1497_v2 = vld [vmem:[%s1707_s1 + $0x10] sm:$0xff] (!%p189_p3)  }
   0x7   : > { %192 = sbr.rel (%p189_p3) target bundleno = 294 (0x126), region = 32  ;;  %p230_p4 = scmp.lt.s32.totalorder (!%p189_p3), %s1193_s18, 63  ;;  %1407 = vmatprep.subr.bf16.mxu0 (!%p189_p3), %v1495_v0  ;;  %1455 = vmatprep.subr.bf16.mxu1 (!%p189_p3), %v1495_v0  ;;  %v1498_v3 = vld [vmem:[%s1707_s1 + $0x18] sm:$0xff] (!%p189_p3)   ;;  %v1499_v6 = vld [vmem:[%s1707_s1 + $0x20] sm:$0xff] (!%p189_p3)   ;;  %v1500_v7 = vld [vmem:[%s1707_s1 + $0x28] sm:$0xff] (!%p189_p3)  }
   0x8   : > { %1408 = vmatpush3.bf16.msra.mxu0 (!%p189_p3), %v1495_v0  ;;  %1463 = vmatpush3.bf16.msra.mxu1 (!%p189_p3), %v1495_v0  ;;  %v1501_v8 = vld [vmem:[%s1707_s1 + $0x30] sm:$0xff] (!%p189_p3)   ;;  %v1502_v9 = vld [vmem:[%s1707_s1 + $0x38] sm:$0xff] (!%p189_p3)   ;;  %v1634_v24 = vld [vmem:[%s1708_s2] ss:$0 sm:$0xff] (!%p189_p3) }
   0x9   : > { %1409 = vmatprep.subr.bf16.mxu0 (!%p189_p3), %v1496_v1  ;;  %1456 = vmatprep.subr.bf16.mxu1 (!%p189_p3), %v1496_v1 }
   0xc   : > { %1410 = vmatpush3.bf16.msra.mxu0 (!%p189_p3), %v1496_v1  ;;  %1464 = vmatpush3.bf16.msra.mxu1 (!%p189_p3), %v1496_v1 }
   0xd   : > { %1411 = vmatprep.subr.bf16.mxu0 (!%p189_p3), %v1497_v2  ;;  %1457 = vmatprep.subr.bf16.mxu1 (!%p189_p3), %v1497_v2 }
   0xe   : > { %s1715_s18 = smov (!%p230_p4, %s1193_s18), 63 }
   0xf   : > { %s1194_s23 = sshll.u32 %s1715_s18, 2 }
  0x10   : > { %s1598_s26 = scalar_lea.vmem %s1706_s0, %s1194_s23  ;;  %1412 = vmatpush3.bf16.msra.mxu0 %v1497_v2  ;;  %1465 = vmatpush3.bf16.msra.mxu1 %v1497_v2  ;;  %s1651_s17 = scalar_lea.vmem %s1709_s3, %s1194_s23 }
  0x11   : > { %v1503_v4 = vld [vmem:[%s1598_s26] sm:$0xff]   ;;  %1413 = vmatprep.subr.bf16.mxu0 %v1498_v3  ;;  %1458 = vmatprep.subr.bf16.mxu1 %v1498_v3  ;;  %v1505_v10 = vld [vmem:[%s1598_s26 + $0x8] sm:$0xff]   ;;  %v1507_v12 = vld [vmem:[%s1598_s26 + $0x10] sm:$0xff]  }
  0x12   : > { %v1504_v5 = vld [vmem:[%s1598_s26 + $0x40] sm:$0xff]   ;;  %1423 = vmatprep.mubr.bf16.mxu0 %v1503_v4  ;;  %v1506_v11 = vld [vmem:[%s1598_s26 + $0x48] sm:$0xff]   ;;  %v1508_v13 = vld [vmem:[%s1598_s26 + $0x50] sm:$0xff]  }
  0x13   : > { %1439 = vmatprep.mubr.bf16.mxu1 %v1504_v5  ;;  %v1509_v14 = vld [vmem:[%s1598_s26 + $0x18] sm:$0xff]   ;;  %v1511_v16 = vld [vmem:[%s1598_s26 + $0x20] sm:$0xff]   ;;  %v1513_v18 = vld [vmem:[%s1598_s26 + $0x28] sm:$0xff]  }
  0x14   : > { %1414 = vmatpush3.bf16.msra.mxu0 %v1498_v3  ;;  %1466 = vmatpush3.bf16.msra.mxu1 %v1498_v3  ;;  %v1510_v15 = vld [vmem:[%s1598_s26 + $0x58] sm:$0xff]   ;;  %v1512_v17 = vld [vmem:[%s1598_s26 + $0x60] sm:$0xff]   ;;  %v1514_v19 = vld [vmem:[%s1598_s26 + $0x68] sm:$0xff]  }
  0x15   : > { %1415 = vmatprep.subr.bf16.mxu0 %v1499_v6  ;;  %1459 = vmatprep.subr.bf16.mxu1 %v1499_v6  ;;  %v1515_v20 = vld [vmem:[%s1598_s26 + $0x30] sm:$0xff]   ;;  %v1517_v22 = vld [vmem:[%s1598_s26 + $0x38] sm:$0xff]  }
  0x16   : > { %v1516_v21 = vld [vmem:[%s1598_s26 + $0x70] sm:$0xff]   ;;  %v1518_v23 = vld [vmem:[%s1598_s26 + $0x78] sm:$0xff]  }
  0x18   : > { %1416 = vmatpush3.bf16.msra.mxu0 %v1499_v6  ;;  %1467 = vmatpush3.bf16.msra.mxu1 %v1499_v6 }
  0x19   : > { %1417 = vmatprep.subr.bf16.mxu0 %v1500_v7  ;;  %1460 = vmatprep.subr.bf16.mxu1 %v1500_v7 }
  0x1c   : > { %1418 = vmatpush3.bf16.msra.mxu0 %v1500_v7  ;;  %1468 = vmatpush3.bf16.msra.mxu1 %v1500_v7 }
  0x1d   : > { %1419 = vmatprep.subr.bf16.mxu0 %v1501_v8  ;;  %1461 = vmatprep.subr.bf16.mxu1 %v1501_v8 }
  0x20   : > { %1420 = vmatpush3.bf16.msra.mxu0 %v1501_v8  ;;  %1469 = vmatpush3.bf16.msra.mxu1 %v1501_v8 }
  0x21   : > { %1421 = vmatprep.subr.bf16.mxu0 %v1502_v9  ;;  %1462 = vmatprep.subr.bf16.mxu1 %v1502_v9 }
  0x24   : > { %1422 = vmatpush3.bf16.msra.mxu0 %v1502_v9  ;;  %1470 = vmatpush3.bf16.msra.mxu1 %v1502_v9 }
  0x27   : > { %1424 = vmatmul.mubr.bf16.vlgmr.msra.gmra.mrb[0].mxu0 %v1505_v10  ;;  %1440 = vmatmul.mubr.bf16.vlgmr.msra.gmra.mrb[0].mxu1 %v1506_v11 }
  0x28   : > { %1427 = vmatprep.mubr.bf16.mxu0 %v1507_v12  ;;  %1443 = vmatprep.mubr.bf16.mxu1 %v1508_v13 }
  0x2f   : > { %1428 = vmatmul.mubr.bf16.gmra.mrb[4].mxu0 %v1509_v14  ;;  %1444 = vmatmul.mubr.bf16.gmra.mrb[4].mxu1 %v1510_v15 }
  0x30   : > { %1431 = vmatprep.mubr.bf16.mxu0 %v1511_v16  ;;  %1447 = vmatprep.mubr.bf16.mxu1 %v1512_v17 }
  0x37   : > { %1432 = vmatmul.mubr.bf16.gmra.mrb[8].mxu0 %v1513_v18  ;;  %1448 = vmatmul.mubr.bf16.gmra.mrb[8].mxu1 %v1514_v19 }
  0x38   : > { %1435 = vmatprep.mubr.bf16.mxu0 %v1515_v20  ;;  %1451 = vmatprep.mubr.bf16.mxu1 %v1516_v21 }
  0x3f   : > { %1436 = vmatmul.mubr.bf16.gmra.mrb[12].mxu0 %v1517_v22  ;;  %1452 = vmatmul.mubr.bf16.gmra.mrb[12].mxu1 %v1518_v23 }
  0xfa   : > { %v1425_v25 = vpop.f32.mrb[0].mxu0  ;;  %v1441_v26 = vpop.f32.mrb[0].mxu1 }
  0xfb   : > { %v789_v27 = vadd.f32 %v1425_v25, %v1634_v24  ;;  %v805_v28 = vadd.f32 %v1441_v26, %v1634_v24  ;;  %v554_v29 = vpop.f32.mrb[1].mxu0  ;;  %v618_v30 = vpop.f32.mrb[1].mxu1 }
  0xfc   : > { %v787_v31 = vadd.f32 %v1634_v24, %v554_v29  ;;  %v803_v32 = vadd.f32 %v1634_v24, %v618_v30  ;;  %v1426_v33 = vpop.f32.mrb[2].mxu0  ;;  %v1442_v34 = vpop.f32.mrb[2].mxu1 }
  0xfd   : > { %vm821_vm0 = vcmp.ge.f32.partialorder %v789_v27, 0.0  ;;  %v853_v35 = vmul.f32 0.01, %v789_v27  ;;  %vm837_vm1 = vcmp.ge.f32.partialorder %v805_v28, 0.0  ;;  %v869_v36 = vmul.f32 0.01, %v805_v28 }
  0xfe   : > { %vm819_vm2 = vcmp.ge.f32.partialorder %v787_v31, 0.0  ;;  %v851_v37 = vmul.f32 0.01, %v787_v31  ;;  %vm835_vm3 = vcmp.ge.f32.partialorder %v803_v32, 0.0  ;;  %v867_v38 = vmul.f32 0.01, %v803_v32 }
  0xff   : > { %v790_v39 = vadd.f32 %v1426_v33, %v1634_v24  ;;  %v806_v40 = vadd.f32 %v1442_v34, %v1634_v24  ;;  %v557_v41 = vpop.f32.mrb[3].mxu0  ;;  %v621_v42 = vpop.f32.mrb[3].mxu1  ;;  %v885_v43 = vsel %vm821_vm0, %v789_v27, %v853_v35  ;;  %v901_v44 = vsel %vm837_vm1, %v805_v28, %v869_v36 }
 0x100   : > { %v788_v45 = vadd.f32 %v1634_v24, %v557_v41  ;;  %v804_v46 = vadd.f32 %v1634_v24, %v621_v42  ;;  %v883_v51 = vsel %vm819_vm2, %v787_v31, %v851_v37  ;;  %v899_v52 = vsel %vm835_vm3, %v803_v32, %v867_v38 }
 0x101   : > { %vm822_vm4 = vcmp.ge.f32.partialorder %v790_v39, 0.0  ;;  %v854_v47 = vmul.f32 0.01, %v790_v39  ;;  %vm838_vm5 = vcmp.ge.f32.partialorder %v806_v40, 0.0  ;;  %v870_v48 = vmul.f32 0.01, %v806_v40 }
 0x102   : > { %vm820_vm6 = vcmp.ge.f32.partialorder %v788_v45, 0.0  ;;  %v852_v49 = vmul.f32 0.01, %v788_v45  ;;  %vm836_vm7 = vcmp.ge.f32.partialorder %v804_v46, 0.0  ;;  %v868_v50 = vmul.f32 0.01, %v804_v46 }
 0x103   : > { %v886_v53 = vsel %vm822_vm4, %v790_v39, %v854_v47  ;;  %v902_v54 = vsel %vm838_vm5, %v806_v40, %v870_v48  ;;  %v1429_v55 = vpop.f32.mrb[4].mxu0  ;;  %v1445_v56 = vpop.f32.mrb[4].mxu1 }
 0x104   : > { %v1296_v57 = vpack.c.bf16 %v886_v53, %v885_v43  ;;  %v1336_v58 = vpack.c.bf16 %v902_v54, %v901_v44  ;;  %v884_v59 = vsel %vm820_vm6, %v788_v45, %v852_v49  ;;  %v900_v60 = vsel %vm836_vm7, %v804_v46, %v868_v50  ;;  %v570_v61 = vpop.f32.mrb[5].mxu0  ;;  %v634_v62 = vpop.f32.mrb[5].mxu1 }
 0x105   : > { %v1291_v63 = vpack.c.bf16 %v884_v59, %v883_v51  ;;  %v1331_v0 = vpack.c.bf16 %v900_v60, %v899_v52  ;;  %v793_v1 = vadd.f32 %v1429_v55, %v1634_v24  ;;  %v809_v2 = vadd.f32 %v1445_v56, %v1634_v24  ;;  %v1430_v3 = vpop.f32.mrb[6].mxu0  ;;  %v1446_v4 = vpop.f32.mrb[6].mxu1 }
 0x106   : > { %1368 = vst [vmem:[%s1651_s17 + $0x8] sm:$0xff] %v1296_v57   ;;  %1376 = vst [vmem:[%s1651_s17 + $0x48] sm:$0xff] %v1336_v58   ;;  %v791_v5 = vadd.f32 %v1634_v24, %v570_v61  ;;  %v807_v6 = vadd.f32 %v1634_v24, %v634_v62  ;;  %v794_v7 = vadd.f32 %v1430_v3, %v1634_v24  ;;  %v573_v9 = vpop.f32.mrb[7].mxu0  ;;  %v637_v10 = vpop.f32.mrb[7].mxu1 }
 0x107   : > { %v810_v8 = vadd.f32 %v1446_v4, %v1634_v24  ;;  %1292 = vst [vmem:[%s1651_s17] sm:$0xff] %v1291_v63   ;;  %1375 = vst [vmem:[%s1651_s17 + $0x40] sm:$0xff] %v1331_v0   ;;  %vm825_vm8 = vcmp.ge.f32.partialorder %v793_v1, 0.0  ;;  %v857_v11 = vmul.f32 0.01, %v793_v1  ;;  %vm841_vm9 = vcmp.ge.f32.partialorder %v809_v2, 0.0 }
 0x108   : > { %v873_v12 = vmul.f32 0.01, %v809_v2  ;;  %vm823_vm10 = vcmp.ge.f32.partialorder %v791_v5, 0.0  ;;  %v855_v13 = vmul.f32 0.01, %v791_v5  ;;  %vm839_vm11 = vcmp.ge.f32.partialorder %v807_v6, 0.0 }
 0x109   : > { %v889_v14 = vsel %vm825_vm8, %v793_v1, %v857_v11  ;;  %v871_v15 = vmul.f32 0.01, %v807_v6  ;;  %vm826_vm12 = vcmp.ge.f32.partialorder %v794_v7, 0.0  ;;  %v858_v16 = vmul.f32 0.01, %v794_v7 }
 0x10a   : > { %v905_v17 = vsel %vm841_vm9, %v809_v2, %v873_v12  ;;  %v887_v18 = vsel %vm823_vm10, %v791_v5, %v855_v13  ;;  %vm842_vm13 = vcmp.ge.f32.partialorder %v810_v8, 0.0  ;;  %v874_v19 = vmul.f32 0.01, %v810_v8  ;;  %v1433_v20 = vpop.f32.mrb[8].mxu0  ;;  %v1449_v21 = vpop.f32.mrb[8].mxu1 }
 0x10b   : > { %v890_v22 = vsel %vm826_vm12, %v794_v7, %v858_v16  ;;  %v792_v23 = vadd.f32 %v1634_v24, %v573_v9  ;;  %v808_v25 = vadd.f32 %v1634_v24, %v637_v10  ;;  %v797_v26 = vadd.f32 %v1433_v20, %v1634_v24  ;;  %v586_v27 = vpop.f32.mrb[9].mxu0  ;;  %v650_v28 = vpop.f32.mrb[9].mxu1 }
 0x10c   : > { %v1306_v29 = vpack.c.bf16 %v890_v22, %v889_v14  ;;  %v906_v30 = vsel %vm842_vm13, %v810_v8, %v874_v19  ;;  %v813_v31 = vadd.f32 %v1449_v21, %v1634_v24  ;;  %v795_v32 = vadd.f32 %v1634_v24, %v586_v27  ;;  %v1434_v33 = vpop.f32.mrb[10].mxu0  ;;  %v1450_v34 = vpop.f32.mrb[10].mxu1 }
 0x10d   : > { %v1346_v35 = vpack.c.bf16 %v906_v30, %v905_v17  ;;  %vm824_vm14 = vcmp.ge.f32.partialorder %v792_v23, 0.0  ;;  %v856_v36 = vmul.f32 0.01, %v792_v23  ;;  %vm840_vm15 = vcmp.ge.f32.partialorder %v808_v25, 0.0  ;;  %v589_v37 = vpop.f32.mrb[11].mxu0  ;;  %v653_v38 = vpop.f32.mrb[11].mxu1 }
 0x10e   : > { %1370 = vst [vmem:[%s1651_s17 + $0x18] sm:$0xff] %v1306_v29   ;;  %v872_v39 = vmul.f32 0.01, %v808_v25  ;;  %vm829_vm0 = vcmp.ge.f32.partialorder %v797_v26, 0.0  ;;  %v861_v40 = vmul.f32 0.01, %v797_v26  ;;  %v903_v41 = vsel %vm839_vm11, %v807_v6, %v871_v15 }
 0x10f   : > { %vm845_vm1 = vcmp.ge.f32.partialorder %v813_v31, 0.0  ;;  %1378 = vst [vmem:[%s1651_s17 + $0x58] sm:$0xff] %v1346_v35   ;;  %v888_v42 = vsel %vm824_vm14, %v792_v23, %v856_v36  ;;  %v877_v43 = vmul.f32 0.01, %v813_v31  ;;  %vm827_vm2 = vcmp.ge.f32.partialorder %v795_v32, 0.0 }
 0x110   : > { %v1301_v44 = vpack.c.bf16 %v888_v42, %v887_v18  ;;  %v904_v45 = vsel %vm840_vm15, %v808_v25, %v872_v39  ;;  %v859_v46 = vmul.f32 0.01, %v795_v32  ;;  %v811_v47 = vadd.f32 %v1634_v24, %v650_v28 }
 0x111   : > { %v1341_v48 = vpack.c.bf16 %v904_v45, %v903_v41  ;;  %v893_v49 = vsel %vm829_vm0, %v797_v26, %v861_v40  ;;  %v909_v50 = vsel %vm845_vm1, %v813_v31, %v877_v43  ;;  %v798_v51 = vadd.f32 %v1434_v33, %v1634_v24 }
 0x112   : > { %1369 = vst [vmem:[%s1651_s17 + $0x10] sm:$0xff] %v1301_v44   ;;  %vm843_vm3 = vcmp.ge.f32.partialorder %v811_v47, 0.0  ;;  %v875_v52 = vmul.f32 0.01, %v811_v47  ;;  %v814_v53 = vadd.f32 %v1450_v34, %v1634_v24  ;;  %v796_v54 = vadd.f32 %v1634_v24, %v589_v37  ;;  %v1437_v55 = vpop.f32.mrb[12].mxu0  ;;  %v1453_v56 = vpop.f32.mrb[12].mxu1 }
 0x113   : > { %1377 = vst [vmem:[%s1651_s17 + $0x50] sm:$0xff] %v1341_v48   ;;  %vm830_vm4 = vcmp.ge.f32.partialorder %v798_v51, 0.0  ;;  %v862_v57 = vmul.f32 0.01, %v798_v51  ;;  %v812_v58 = vadd.f32 %v1634_v24, %v653_v38  ;;  %v801_v59 = vadd.f32 %v1437_v55, %v1634_v24  ;;  %v602_v60 = vpop.f32.mrb[13].mxu0  ;;  %v666_v61 = vpop.f32.mrb[13].mxu1 }
 0x114   : > { %v891_v62 = vsel %vm827_vm2, %v795_v32, %v859_v46  ;;  %vm846_vm5 = vcmp.ge.f32.partialorder %v814_v53, 0.0  ;;  %v878_v63 = vmul.f32 0.01, %v814_v53  ;;  %vm828_vm6 = vcmp.ge.f32.partialorder %v796_v54, 0.0  ;;  %v1438_v0 = vpop.f32.mrb[14].mxu0  ;;  %v1454_v1 = vpop.f32.mrb[14].mxu1 }
 0x115   : > { %v894_v2 = vsel %vm830_vm4, %v798_v51, %v862_v57  ;;  %v860_v3 = vmul.f32 0.01, %v796_v54  ;;  %vm844_vm7 = vcmp.ge.f32.partialorder %v812_v58, 0.0  ;;  %v876_v4 = vmul.f32 0.01, %v812_v58  ;;  %v605_v5 = vpop.f32.mrb[15].mxu0 }
 0x116   : > { %v907_v6 = vsel %vm843_vm3, %v811_v47, %v875_v52  ;;  %v1316_v7 = vpack.c.bf16 %v894_v2, %v893_v49  ;;  %v910_v8 = vsel %vm846_vm5, %v814_v53, %v878_v63  ;;  %v865_v9 = vmul.f32 0.01, %v801_v59  ;;  %v669_v10 = vpop.f32.mrb[15].mxu1 }
 0x117   : > { %v1356_v11 = vpack.c.bf16 %v910_v8, %v909_v50  ;;  %v892_v12 = vsel %vm828_vm6, %v796_v54, %v860_v3  ;;  %v908_v13 = vsel %vm844_vm7, %v812_v58, %v876_v4  ;;  %v817_v14 = vadd.f32 %v1453_v56, %v1634_v24 }
 0x118   : > { %1372 = vst [vmem:[%s1651_s17 + $0x28] sm:$0xff] %v1316_v7   ;;  %v1311_v15 = vpack.c.bf16 %v892_v12, %v891_v62  ;;  %v1351_v16 = vpack.c.bf16 %v908_v13, %v907_v6  ;;  %vm833_vm8 = vcmp.ge.f32.partialorder %v801_v59, 0.0  ;;  %v799_v17 = vadd.f32 %v1634_v24, %v602_v60 }
 0x119   : > { %1380 = vst [vmem:[%s1651_s17 + $0x68] sm:$0xff] %v1356_v11   ;;  %vm849_vm9 = vcmp.ge.f32.partialorder %v817_v14, 0.0  ;;  %v881_v18 = vmul.f32 0.01, %v817_v14  ;;  %v815_v19 = vadd.f32 %v1634_v24, %v666_v61  ;;  %v802_v20 = vadd.f32 %v1438_v0, %v1634_v24 }
 0x11a   : > { %1371 = vst [vmem:[%s1651_s17 + $0x20] sm:$0xff] %v1311_v15   ;;  %1379 = vst [vmem:[%s1651_s17 + $0x60] sm:$0xff] %v1351_v16   ;;  %v863_v21 = vmul.f32 0.01, %v799_v17  ;;  %v818_v22 = vadd.f32 %v1454_v1, %v1634_v24  ;;  %v800_v23 = vadd.f32 %v1634_v24, %v605_v5  ;;  %v897_v25 = vsel %vm833_vm8, %v801_v59, %v865_v9 }
 0x11b   : > { %vm831_vm10 = vcmp.ge.f32.partialorder %v799_v17, 0.0  ;;  %vm834_vm11 = vcmp.ge.f32.partialorder %v802_v20, 0.0  ;;  %v913_v26 = vsel %vm849_vm9, %v817_v14, %v881_v18  ;;  %v866_v27 = vmul.f32 0.01, %v802_v20 }
 0x11c   : > { %vm850_vm12 = vcmp.ge.f32.partialorder %v818_v22, 0.0  ;;  %v882_v28 = vmul.f32 0.01, %v818_v22  ;;  %vm847_vm13 = vcmp.ge.f32.partialorder %v815_v19, 0.0  ;;  %vm832_vm14 = vcmp.ge.f32.partialorder %v800_v23, 0.0 }
 0x11d   : > { %v864_v29 = vmul.f32 0.01, %v800_v23  ;;  %v816_v30 = vadd.f32 %v1634_v24, %v669_v10  ;;  %v895_v31 = vsel %vm831_vm10, %v799_v17, %v863_v21  ;;  %v879_v32 = vmul.f32 0.01, %v815_v19 }
 0x11e   : > { %v898_v33 = vsel %vm834_vm11, %v802_v20, %v866_v27  ;;  %v914_v34 = vsel %vm850_vm12, %v818_v22, %v882_v28 }
 0x11f   : > { %v1326_v35 = vpack.c.bf16 %v898_v33, %v897_v25  ;;  %v1366_v36 = vpack.c.bf16 %v914_v34, %v913_v26  ;;  %v896_v37 = vsel %vm832_vm14, %v800_v23, %v864_v29  ;;  %vm848_vm15 = vcmp.ge.f32.partialorder %v816_v30, 0.0 }
 0x120   : > { %v1321_v38 = vpack.c.bf16 %v896_v37, %v895_v31  ;;  %v880_v39 = vmul.f32 0.01, %v816_v30  ;;  %v911_v40 = vsel %vm847_vm13, %v815_v19, %v879_v32 }
 0x121   : > { %1374 = vst [vmem:[%s1651_s17 + $0x38] sm:$0xff] %v1326_v35   ;;  %1382 = vst [vmem:[%s1651_s17 + $0x78] sm:$0xff] %v1366_v36  }
 0x122   : > { %1373 = vst [vmem:[%s1651_s17 + $0x30] sm:$0xff] %v1321_v38   ;;  %v912_v41 = vsel %vm848_vm15, %v816_v30, %v880_v39 }
 0x123   : > { %v1361_v42 = vpack.c.bf16 %v912_v41, %v911_v40 }
 0x125   : > { %1381 = vst [vmem:[%s1651_s17 + $0x70] sm:$0xff] %v1361_v42  }
 0x126 PF: > { %s13_s14 = sadd.s32 1, %s1541_s14   ;;  %s1710_s12 = smov %s1537_s13 }
 0x127   : > { %p10_p5 = scmp.ge.s32.totalorder %s13_s14, 4   ;;  %s1711_s13 = smov %s1713_s15 }
 0x129   :  { %12 = sbr.rel (!%p10_p5) target bundleno = 2 (0x2), region = 76 }

// kernel: encoder_forward.6
= control target key start
LH: loop header
LB: loop body
LE: loop exit
PB: predicated region body
PF: predicated region fallthrough
CT: control target
= control target key end

     0   :  { %s971_s1 = inlined_call_operand.vmem [shape: bf16[256,128], index: 1, kind: input, shape index: {}]   ;;  %s972_s0 = inlined_call_operand.vmem [shape: bf16[128,256], index: 0, kind: input, shape index: {}]   ;;  %s973_s2 = inlined_call_operand.vmem [shape: f32[1,128], index: 2, kind: input, shape index: {}]   ;;  %s974_s3 = inlined_call_operand.vmem [shape: bf16[128,128], index: 3, kind: output, shape index: {}]  }
   0x1   :  { %v770_v0 = vld [vmem:[%s971_s1 + $0x40] sm:$0xff]   ;;  %v772_v2 = vld [vmem:[%s971_s1 + $0x48] sm:$0xff]   ;;  %v774_v4 = vld [vmem:[%s971_s1 + $0x50] sm:$0xff]  }
   0x2   :  { %v771_v1 = vld [vmem:[%s971_s1] sm:$0xff]   ;;  %690 = vmatprep.subr.bf16.mxu0 %v770_v0  ;;  %754 = vmatprep.subr.bf16.mxu1 %v770_v0  ;;  %v773_v3 = vld [vmem:[%s971_s1 + $0x8] sm:$0xff]   ;;  %v775_v5 = vld [vmem:[%s971_s1 + $0x10] sm:$0xff]  }
   0x3   :  { %691 = vmatpush3.bf16.msra.mxu0 %v771_v1  ;;  %762 = vmatpush3.bf16.msra.mxu1 %v771_v1  ;;  %v776_v6 = vld [vmem:[%s971_s1 + $0x58] sm:$0xff]   ;;  %v778_v8 = vld [vmem:[%s971_s1 + $0x60] sm:$0xff]   ;;  %v780_v10 = vld [vmem:[%s971_s1 + $0x68] sm:$0xff]  }
   0x4   :  { %692 = vmatprep.subr.bf16.mxu0 %v772_v2  ;;  %755 = vmatprep.subr.bf16.mxu1 %v772_v2  ;;  %v777_v7 = vld [vmem:[%s971_s1 + $0x18] sm:$0xff]   ;;  %v779_v9 = vld [vmem:[%s971_s1 + $0x20] sm:$0xff]   ;;  %v781_v13 = vld [vmem:[%s971_s1 + $0x28] sm:$0xff]  }
   0x5   :  { %v788_v11 = vld [vmem:[%s972_s0 + $0x4] ss:$8 sps:$4 sm:$0xff]   ;;  %v782_v14 = vld [vmem:[%s971_s1 + $0x70] sm:$0xff]   ;;  %v784_v16 = vld [vmem:[%s971_s1 + $0x78] sm:$0xff]  }
   0x6   :  { %v791_v12 = vld [vmem:[%s972_s0 + $0x44] ss:$8 sps:$4 sm:$0xff]   ;;  %307 = vmatprep.mubr.bf16.mxu0 %v788_v11  ;;  %v783_v15 = vld [vmem:[%s971_s1 + $0x30] sm:$0xff]   ;;  %v785_v17 = vld [vmem:[%s971_s1 + $0x38] sm:$0xff]  }
   0x7   :  { %693 = vmatpush3.bf16.msra.mxu0 %v773_v3  ;;  %763 = vmatpush3.bf16.msra.mxu1 %v773_v3  ;;  %v786_v18 = vld [vmem:[%s972_s0] ss:$8 sps:$4 sm:$0xff]   ;;  %v792_v20 = vld [vmem:[%s972_s0 + $0x14] ss:$8 sps:$4 sm:$0xff]   ;;  %v796_v22 = vld [vmem:[%s972_s0 + $0x10] ss:$8 sps:$4 sm:$0xff]  }
   0x8   :  { %694 = vmatprep.subr.bf16.mxu0 %v774_v4  ;;  %756 = vmatprep.subr.bf16.mxu1 %v774_v4  ;;  %v789_v19 = vld [vmem:[%s972_s0 + $0x40] ss:$8 sps:$4 sm:$0xff]   ;;  %v794_v21 = vld [vmem:[%s972_s0 + $0x54] ss:$8 sps:$4 sm:$0xff]   ;;  %v797_v23 = vld [vmem:[%s972_s0 + $0x50] ss:$8 sps:$4 sm:$0xff]  }
   0x9   :  { %339 = vmatprep.mubr.bf16.mxu1 %v791_v12  ;;  %v798_v24 = vld [vmem:[%s972_s0 + $0x24] ss:$8 sps:$4 sm:$0xff]   ;;  %v802_v26 = vld [vmem:[%s972_s0 + $0x20] ss:$8 sps:$4 sm:$0xff]   ;;  %v804_v28 = vld [vmem:[%s972_s0 + $0x34] ss:$8 sps:$4 sm:$0xff]  }
   0xa   :  { %v800_v25 = vld [vmem:[%s972_s0 + $0x64] ss:$8 sps:$4 sm:$0xff]   ;;  %v803_v27 = vld [vmem:[%s972_s0 + $0x60] ss:$8 sps:$4 sm:$0xff]   ;;  %v806_v29 = vld [vmem:[%s972_s0 + $0x74] ss:$8 sps:$4 sm:$0xff]  }
   0xb   :  { %695 = vmatpush3.bf16.msra.mxu0 %v775_v5  ;;  %764 = vmatpush3.bf16.msra.mxu1 %v775_v5  ;;  %v808_v30 = vld [vmem:[%s972_s0 + $0x30] ss:$8 sps:$4 sm:$0xff]   ;;  %v929_v35 = vld [vmem:[%s973_s2] ss:$0 sm:$0xff] }
   0xc   :  { %696 = vmatprep.subr.bf16.mxu0 %v776_v6  ;;  %757 = vmatprep.subr.bf16.mxu1 %v776_v6  ;;  %v809_v31 = vld [vmem:[%s972_s0 + $0x70] ss:$8 sps:$4 sm:$0xff]  }
   0xf   :  { %697 = vmatpush3.bf16.msra.mxu0 %v777_v7  ;;  %765 = vmatpush3.bf16.msra.mxu1 %v777_v7 }
  0x10   :  { %698 = vmatprep.subr.bf16.mxu0 %v778_v8  ;;  %758 = vmatprep.subr.bf16.mxu1 %v778_v8 }
  0x13   :  { %699 = vmatpush3.bf16.msra.mxu0 %v779_v9  ;;  %766 = vmatpush3.bf16.msra.mxu1 %v779_v9 }
  0x14   :  { %700 = vmatprep.subr.bf16.mxu0 %v780_v10  ;;  %759 = vmatprep.subr.bf16.mxu1 %v780_v10 }
  0x17   :  { %701 = vmatpush3.bf16.msra.mxu0 %v781_v13  ;;  %767 = vmatpush3.bf16.msra.mxu1 %v781_v13 }
  0x18   :  { %702 = vmatprep.subr.bf16.mxu0 %v782_v14  ;;  %760 = vmatprep.subr.bf16.mxu1 %v782_v14 }
  0x1b   :  { %703 = vmatpush3.bf16.msra.mxu0 %v783_v15  ;;  %768 = vmatpush3.bf16.msra.mxu1 %v783_v15 }
  0x1c   :  { %704 = vmatprep.subr.bf16.mxu0 %v784_v16  ;;  %761 = vmatprep.subr.bf16.mxu1 %v784_v16 }
  0x1f   :  { %705 = vmatpush3.bf16.msra.mxu0 %v785_v17  ;;  %769 = vmatpush3.bf16.msra.mxu1 %v785_v17 }
  0x22   :  { %308 = vmatmul.mubr.bf16.vlgmr.msra.gmra.mrb[0].mxu0 %v786_v18  ;;  %340 = vmatmul.mubr.bf16.vlgmr.msra.gmra.mrb[0].mxu1 %v789_v19 }
  0x23   :  { %315 = vmatprep.mubr.bf16.mxu0 %v792_v20  ;;  %347 = vmatprep.mubr.bf16.mxu1 %v794_v21 }
  0x2a   :  { %316 = vmatmul.mubr.bf16.gmra.mrb[4].mxu0 %v796_v22  ;;  %348 = vmatmul.mubr.bf16.gmra.mrb[4].mxu1 %v797_v23 }
  0x2b   :  { %323 = vmatprep.mubr.bf16.mxu0 %v798_v24  ;;  %355 = vmatprep.mubr.bf16.mxu1 %v800_v25 }
  0x32   :  { %324 = vmatmul.mubr.bf16.gmra.mrb[8].mxu0 %v802_v26  ;;  %356 = vmatmul.mubr.bf16.gmra.mrb[8].mxu1 %v803_v27 }
  0x33   :  { %331 = vmatprep.mubr.bf16.mxu0 %v804_v28  ;;  %363 = vmatprep.mubr.bf16.mxu1 %v806_v29 }
  0x3a   :  { %332 = vmatmul.mubr.bf16.gmra.mrb[12].mxu0 %v808_v30  ;;  %364 = vmatmul.mubr.bf16.gmra.mrb[12].mxu1 %v809_v31 }
  0xf5   :  { %v706_v32 = vpop.f32.mrb[0].mxu0  ;;  %v730_v33 = vpop.f32.mrb[0].mxu1 }
  0xf6   :  { %v707_v34 = vpop.f32.mrb[1].mxu0  ;;  %v731_v36 = vpop.f32.mrb[1].mxu1 }
  0xf7   :  { %v708_v37 = vadd.f32 %v707_v34, %v706_v32  ;;  %v732_v38 = vadd.f32 %v731_v36, %v730_v33  ;;  %v709_v39 = vpop.f32.mrb[2].mxu0  ;;  %v733_v40 = vpop.f32.mrb[2].mxu1 }
  0xf8   :  { %v710_v41 = vpop.f32.mrb[3].mxu0  ;;  %v734_v42 = vpop.f32.mrb[3].mxu1 }
  0xf9   :  { %v430_v43 = vadd.f32 %v708_v37, %v929_v35  ;;  %v438_v44 = vadd.f32 %v732_v38, %v929_v35  ;;  %v711_v45 = vadd.f32 %v710_v41, %v709_v39  ;;  %v735_v46 = vadd.f32 %v734_v42, %v733_v40 }
  0xfb   :  { %v462_v47 = vmul.f32 0.01, %v430_v43  ;;  %v470_v48 = vmul.f32 0.01, %v438_v44  ;;  %vm446_vm0 = vcmp.ge.f32.partialorder %v430_v43, 0.0  ;;  %vm454_vm1 = vcmp.ge.f32.partialorder %v438_v44, 0.0 }
  0xfc   :  { %v431_v49 = vadd.f32 %v711_v45, %v929_v35  ;;  %v439_v50 = vadd.f32 %v735_v46, %v929_v35 }
  0xfd   :  { %v712_v51 = vpop.f32.mrb[4].mxu0  ;;  %v736_v52 = vpop.f32.mrb[4].mxu1  ;;  %v478_v55 = vsel %vm446_vm0, %v430_v43, %v462_v47  ;;  %v486_v56 = vsel %vm454_vm1, %v438_v44, %v470_v48 }
  0xfe   :  { %vm447_vm2 = vcmp.ge.f32.partialorder %v431_v49, 0.0  ;;  %v463_v53 = vmul.f32 0.01, %v431_v49  ;;  %vm455_vm3 = vcmp.ge.f32.partialorder %v439_v50, 0.0  ;;  %v471_v54 = vmul.f32 0.01, %v439_v50 }
  0xff   :  { %v713_v57 = vpop.f32.mrb[5].mxu0  ;;  %v737_v58 = vpop.f32.mrb[5].mxu1 }
 0x100   :  { %v479_v59 = vsel %vm447_vm2, %v431_v49, %v463_v53  ;;  %v487_v60 = vsel %vm455_vm3, %v439_v50, %v471_v54  ;;  %v714_v61 = vadd.f32 %v713_v57, %v712_v51  ;;  %v738_v62 = vadd.f32 %v737_v58, %v736_v52  ;;  %v715_v63 = vpop.f32.mrb[6].mxu0  ;;  %v739_v0 = vpop.f32.mrb[6].mxu1 }
 0x101   :  { %v646_v1 = vpack.c.bf16 %v479_v59, %v478_v55  ;;  %v666_v2 = vpack.c.bf16 %v487_v60, %v486_v56  ;;  %v716_v3 = vpop.f32.mrb[7].mxu0  ;;  %v740_v4 = vpop.f32.mrb[7].mxu1 }
 0x102   :  { %v432_v5 = vadd.f32 %v714_v61, %v929_v35  ;;  %v440_v6 = vadd.f32 %v738_v62, %v929_v35  ;;  %v717_v7 = vadd.f32 %v716_v3, %v715_v63  ;;  %v741_v8 = vadd.f32 %v740_v4, %v739_v0 }
 0x103   :  { %647 = vst [vmem:[%s974_s3] sm:$0xff] %v646_v1   ;;  %686 = vst [vmem:[%s974_s3 + $0x20] sm:$0xff] %v666_v2  }
 0x104   :  { %v464_v9 = vmul.f32 0.01, %v432_v5  ;;  %v472_v10 = vmul.f32 0.01, %v440_v6  ;;  %v433_v11 = vadd.f32 %v717_v7, %v929_v35  ;;  %v441_v12 = vadd.f32 %v741_v8, %v929_v35 }
 0x105   :  { %v718_v13 = vpop.f32.mrb[8].mxu0  ;;  %v742_v14 = vpop.f32.mrb[8].mxu1  ;;  %vm448_vm4 = vcmp.ge.f32.partialorder %v432_v5, 0.0  ;;  %vm456_vm5 = vcmp.ge.f32.partialorder %v440_v6, 0.0 }
 0x106   :  { %v719_v15 = vpop.f32.mrb[9].mxu0  ;;  %v743_v16 = vpop.f32.mrb[9].mxu1  ;;  %vm449_vm6 = vcmp.ge.f32.partialorder %v433_v11, 0.0  ;;  %v465_v17 = vmul.f32 0.01, %v433_v11  ;;  %vm457_vm7 = vcmp.ge.f32.partialorder %v441_v12, 0.0  ;;  %v480_v23 = vsel %vm448_vm4, %v432_v5, %v464_v9 }
 0x107   :  { %v473_v18 = vmul.f32 0.01, %v441_v12  ;;  %v720_v19 = vadd.f32 %v719_v15, %v718_v13  ;;  %v744_v20 = vadd.f32 %v743_v16, %v742_v14  ;;  %v721_v21 = vpop.f32.mrb[10].mxu0  ;;  %v745_v22 = vpop.f32.mrb[10].mxu1  ;;  %v488_v24 = vsel %vm456_vm5, %v440_v6, %v472_v10 }
 0x108   :  { %v481_v25 = vsel %vm449_vm6, %v433_v11, %v465_v17  ;;  %v722_v27 = vpop.f32.mrb[11].mxu0  ;;  %v746_v28 = vpop.f32.mrb[11].mxu1 }
 0x109   :  { %v489_v26 = vsel %vm457_vm7, %v441_v12, %v473_v18  ;;  %v651_v29 = vpack.c.bf16 %v481_v25, %v480_v23  ;;  %v434_v31 = vadd.f32 %v720_v19, %v929_v35  ;;  %v442_v32 = vadd.f32 %v744_v20, %v929_v35 }
 0x10a   :  { %v671_v30 = vpack.c.bf16 %v489_v26, %v488_v24  ;;  %v723_v33 = vadd.f32 %v722_v27, %v721_v21  ;;  %v747_v34 = vadd.f32 %v746_v28, %v745_v22 }
 0x10b   :  { %683 = vst [vmem:[%s974_s3 + $0x8] sm:$0xff] %v651_v29   ;;  %v466_v36 = vmul.f32 0.01, %v434_v31  ;;  %v474_v37 = vmul.f32 0.01, %v442_v32  ;;  %vm450_vm8 = vcmp.ge.f32.partialorder %v434_v31, 0.0 }
 0x10c   :  { %687 = vst [vmem:[%s974_s3 + $0x28] sm:$0xff] %v671_v30   ;;  %v435_v38 = vadd.f32 %v723_v33, %v929_v35  ;;  %v443_v39 = vadd.f32 %v747_v34, %v929_v35  ;;  %vm458_vm9 = vcmp.ge.f32.partialorder %v442_v32, 0.0 }
 0x10d   :  { %v724_v40 = vpop.f32.mrb[12].mxu0  ;;  %v748_v41 = vpop.f32.mrb[12].mxu1  ;;  %v482_v50 = vsel %vm450_vm8, %v434_v31, %v466_v36  ;;  %v490_v51 = vsel %vm458_vm9, %v442_v32, %v474_v37 }
 0x10e   :  { %v725_v42 = vpop.f32.mrb[13].mxu0  ;;  %v749_v43 = vpop.f32.mrb[13].mxu1  ;;  %vm451_vm10 = vcmp.ge.f32.partialorder %v435_v38, 0.0  ;;  %v467_v44 = vmul.f32 0.01, %v435_v38  ;;  %vm459_vm11 = vcmp.ge.f32.partialorder %v443_v39, 0.0 }
 0x10f   :  { %v475_v45 = vmul.f32 0.01, %v443_v39  ;;  %v726_v46 = vadd.f32 %v725_v42, %v724_v40  ;;  %v750_v47 = vadd.f32 %v749_v43, %v748_v41  ;;  %v727_v48 = vpop.f32.mrb[14].mxu0  ;;  %v751_v49 = vpop.f32.mrb[14].mxu1 }
 0x110   :  { %v483_v52 = vsel %vm451_vm10, %v435_v38, %v467_v44  ;;  %v728_v54 = vpop.f32.mrb[15].mxu0  ;;  %v752_v55 = vpop.f32.mrb[15].mxu1 }
 0x111   :  { %v491_v53 = vsel %vm459_vm11, %v443_v39, %v475_v45  ;;  %v656_v56 = vpack.c.bf16 %v483_v52, %v482_v50  ;;  %v436_v58 = vadd.f32 %v726_v46, %v929_v35  ;;  %v444_v59 = vadd.f32 %v750_v47, %v929_v35 }
 0x112   :  { %v676_v57 = vpack.c.bf16 %v491_v53, %v490_v51  ;;  %v729_v60 = vadd.f32 %v728_v54, %v727_v48  ;;  %v753_v61 = vadd.f32 %v752_v55, %v751_v49 }
 0x113   :  { %684 = vst [vmem:[%s974_s3 + $0x10] sm:$0xff] %v656_v56   ;;  %v468_v62 = vmul.f32 0.01, %v436_v58  ;;  %v476_v63 = vmul.f32 0.01, %v444_v59  ;;  %vm452_vm12 = vcmp.ge.f32.partialorder %v436_v58, 0.0 }
 0x114   :  { %688 = vst [vmem:[%s974_s3 + $0x30] sm:$0xff] %v676_v57   ;;  %v437_v0 = vadd.f32 %v729_v60, %v929_v35  ;;  %v445_v1 = vadd.f32 %v753_v61, %v929_v35  ;;  %vm460_vm13 = vcmp.ge.f32.partialorder %v444_v59, 0.0 }
 0x115   :  { %v484_v4 = vsel %vm452_vm12, %v436_v58, %v468_v62  ;;  %v492_v5 = vsel %vm460_vm13, %v444_v59, %v476_v63 }
 0x116   :  { %vm453_vm14 = vcmp.ge.f32.partialorder %v437_v0, 0.0  ;;  %v469_v2 = vmul.f32 0.01, %v437_v0  ;;  %vm461_vm15 = vcmp.ge.f32.partialorder %v445_v1, 0.0  ;;  %v477_v3 = vmul.f32 0.01, %v445_v1 }
 0x118   :  { %v485_v6 = vsel %vm453_vm14, %v437_v0, %v469_v2  ;;  %v493_v7 = vsel %vm461_vm15, %v445_v1, %v477_v3 }
 0x119   :  { %v661_v8 = vpack.c.bf16 %v485_v6, %v484_v4  ;;  %v681_v9 = vpack.c.bf16 %v493_v7, %v492_v5 }
 0x11b   :  { %685 = vst [vmem:[%s974_s3 + $0x18] sm:$0xff] %v661_v8   ;;  %689 = vst [vmem:[%s974_s3 + $0x38] sm:$0xff] %v681_v9  }

// kernel: encoder_forward.7
= control target key start
LH: loop header
LB: loop body
LE: loop exit
PB: predicated region body
PF: predicated region fallthrough
CT: control target
= control target key end

     0   :  { %s800_s1 = inlined_call_operand.vmem [shape: bf16[512,128], index: 1, kind: input, shape index: {}]   ;;  %s801_s0 = inlined_call_operand.vmem [shape: bf16[32,512], index: 0, kind: input, shape index: {}]   ;;  %s802_s2 = inlined_call_operand.vmem [shape: f32[1,128], index: 2, kind: input, shape index: {}]   ;;  %s803_s3 = inlined_call_operand.vmem [shape: bf16[32,128], index: 3, kind: output, shape index: {}]  }
   0x1   :  { %v607_v0 = vld [vmem:[%s800_s1 + $0x40] sm:$0xff]   ;;  %v611_v4 = vld [vmem:[%s800_s1 + $0x48] sm:$0xff]   ;;  %v615_v8 = vld [vmem:[%s800_s1 + $0x50] sm:$0xff]  }
   0x2   :  { %v608_v1 = vld [vmem:[%s800_s1 + $0xc0] sm:$0xff]   ;;  %551 = vmatprep.subr.bf16.mxu0 %v607_v0  ;;  %v612_v5 = vld [vmem:[%s800_s1 + $0xc8] sm:$0xff]   ;;  %v616_v9 = vld [vmem:[%s800_s1 + $0xd0] sm:$0xff]  }
   0x3   :  { %v609_v2 = vld [vmem:[%s800_s1] sm:$0xff]   ;;  %579 = vmatprep.subr.bf16.mxu1 %v608_v1  ;;  %v613_v6 = vld [vmem:[%s800_s1 + $0x8] sm:$0xff]   ;;  %v617_v10 = vld [vmem:[%s800_s1 + $0x10] sm:$0xff]  }
   0x4   :  { %v610_v3 = vld [vmem:[%s800_s1 + $0x80] sm:$0xff]   ;;  %552 = vmatpush3.bf16.msra.mxu0 %v609_v2  ;;  %v614_v7 = vld [vmem:[%s800_s1 + $0x88] sm:$0xff]   ;;  %v618_v11 = vld [vmem:[%s800_s1 + $0x90] sm:$0xff]  }
   0x5   :  { %580 = vmatpush3.bf16.msra.mxu1 %v610_v3  ;;  %553 = vmatprep.subr.bf16.mxu0 %v611_v4  ;;  %v619_v12 = vld [vmem:[%s800_s1 + $0x58] sm:$0xff]   ;;  %v623_v16 = vld [vmem:[%s800_s1 + $0x60] sm:$0xff]   ;;  %v627_v20 = vld [vmem:[%s800_s1 + $0x68] sm:$0xff]  }
   0x6   :  { %581 = vmatprep.subr.bf16.mxu1 %v612_v5  ;;  %v620_v13 = vld [vmem:[%s800_s1 + $0xd8] sm:$0xff]   ;;  %v624_v17 = vld [vmem:[%s800_s1 + $0xe0] sm:$0xff]   ;;  %v628_v21 = vld [vmem:[%s800_s1 + $0xe8] sm:$0xff]  }
   0x7   :  { %v621_v14 = vld [vmem:[%s800_s1 + $0x18] sm:$0xff]   ;;  %v625_v18 = vld [vmem:[%s800_s1 + $0x20] sm:$0xff]   ;;  %v629_v22 = vld [vmem:[%s800_s1 + $0x28] sm:$0xff]  }
   0x8   :  { %554 = vmatpush3.bf16.msra.mxu0 %v613_v6  ;;  %v622_v15 = vld [vmem:[%s800_s1 + $0x98] sm:$0xff]   ;;  %v626_v19 = vld [vmem:[%s800_s1 + $0xa0] sm:$0xff]   ;;  %v630_v23 = vld [vmem:[%s800_s1 + $0xa8] sm:$0xff]  }
   0x9   :  { %582 = vmatpush3.bf16.msra.mxu1 %v614_v7  ;;  %555 = vmatprep.subr.bf16.mxu0 %v615_v8  ;;  %v631_v24 = vld [vmem:[%s800_s1 + $0x70] sm:$0xff]   ;;  %v635_v28 = vld [vmem:[%s800_s1 + $0x78] sm:$0xff]   ;;  %v531_v49 = vld [vmem:[%s802_s2] ss:$0 sm:$0xff] }
   0xa   :  { %583 = vmatprep.subr.bf16.mxu1 %v616_v9  ;;  %v632_v25 = vld [vmem:[%s800_s1 + $0xf0] sm:$0xff]   ;;  %v636_v29 = vld [vmem:[%s800_s1 + $0xf8] sm:$0xff]  }
   0xb   :  { %v633_v26 = vld [vmem:[%s800_s1 + $0x30] sm:$0xff]   ;;  %v637_v30 = vld [vmem:[%s800_s1 + $0x38] sm:$0xff]  }
   0xc   :  { %556 = vmatpush3.bf16.msra.mxu0 %v617_v10  ;;  %v634_v27 = vld [vmem:[%s800_s1 + $0xb0] sm:$0xff]   ;;  %v638_v31 = vld [vmem:[%s800_s1 + $0xb8] sm:$0xff]  }
   0xd   :  { %584 = vmatpush3.bf16.msra.mxu1 %v618_v11  ;;  %557 = vmatprep.subr.bf16.mxu0 %v619_v12  ;;  %v639_v32 = vld [vmem:[%s801_s0] ss:$16 sps:$4 sm:$0xff]   ;;  %v641_v33 = vld [vmem:[%s801_s0 + $0x4] ss:$16 sps:$4 sm:$0xff]   ;;  %v642_v34 = vld [vmem:[%s801_s0 + $0x8] ss:$16 sps:$4 sm:$0xff]  }
   0xe   :  { %585 = vmatprep.subr.bf16.mxu1 %v620_v13  ;;  %v644_v35 = vld [vmem:[%s801_s0 + $0xc] ss:$16 sps:$4 sm:$0xff]   ;;  %363 = vmatprep.mubr.bf16.mxu0 %v641_v33  ;;  %v645_v36 = vld [vmem:[%s801_s0 + $0x24] ss:$16 sps:$4 sm:$0xff]   ;;  %v649_v38 = vld [vmem:[%s801_s0 + $0x20] ss:$16 sps:$4 sm:$0xff]  }
   0xf   :  { %412 = vmatprep.mubr.bf16.mxu1 %v644_v35  ;;  %v647_v37 = vld [vmem:[%s801_s0 + $0x2c] ss:$16 sps:$4 sm:$0xff]   ;;  %v650_v39 = vld [vmem:[%s801_s0 + $0x28] ss:$16 sps:$4 sm:$0xff]  }
  0x10   :  { %558 = vmatpush3.bf16.msra.mxu0 %v621_v14 }
  0x11   :  { %586 = vmatpush3.bf16.msra.mxu1 %v622_v15  ;;  %559 = vmatprep.subr.bf16.mxu0 %v623_v16 }
  0x12   :  { %587 = vmatprep.subr.bf16.mxu1 %v624_v17 }
  0x14   :  { %560 = vmatpush3.bf16.msra.mxu0 %v625_v18 }
  0x15   :  { %588 = vmatpush3.bf16.msra.mxu1 %v626_v19  ;;  %561 = vmatprep.subr.bf16.mxu0 %v627_v20 }
  0x16   :  { %589 = vmatprep.subr.bf16.mxu1 %v628_v21 }
  0x18   :  { %562 = vmatpush3.bf16.msra.mxu0 %v629_v22 }
  0x19   :  { %590 = vmatpush3.bf16.msra.mxu1 %v630_v23  ;;  %563 = vmatprep.subr.bf16.mxu0 %v631_v24 }
  0x1a   :  { %591 = vmatprep.subr.bf16.mxu1 %v632_v25 }
  0x1c   :  { %564 = vmatpush3.bf16.msra.mxu0 %v633_v26 }
  0x1d   :  { %592 = vmatpush3.bf16.msra.mxu1 %v634_v27  ;;  %565 = vmatprep.subr.bf16.mxu0 %v635_v28 }
  0x1e   :  { %593 = vmatprep.subr.bf16.mxu1 %v636_v29 }
  0x20   :  { %566 = vmatpush3.bf16.msra.mxu0 %v637_v30 }
  0x21   :  { %594 = vmatpush3.bf16.msra.mxu1 %v638_v31 }
  0x23   :  { %364 = vmatmul.mubr.bf16.vlgmr.msra.gmra.mrb[0].mxu0 %v639_v32 }
  0x24   :  { %413 = vmatmul.mubr.bf16.vlgmr.msra.gmra.mrb[0].mxu1 %v642_v34  ;;  %371 = vmatprep.mubr.bf16.mxu0 %v645_v36 }
  0x25   :  { %420 = vmatprep.mubr.bf16.mxu1 %v647_v37 }
  0x2b   :  { %372 = vmatmul.mubr.bf16.gmra.mrb[4].mxu0 %v649_v38 }
  0x2c   :  { %421 = vmatmul.mubr.bf16.gmra.mrb[4].mxu1 %v650_v39 }
  0xf6   :  { %v567_v40 = vpop.f32.mrb[0].mxu0 }
  0xf7   :  { %v595_v41 = vpop.f32.mrb[0].mxu1  ;;  %v568_v42 = vpop.f32.mrb[1].mxu0 }
  0xf8   :  { %v569_v43 = vadd.f32 %v568_v42, %v567_v40  ;;  %v596_v44 = vpop.f32.mrb[1].mxu1  ;;  %v570_v45 = vpop.f32.mrb[2].mxu0 }
  0xf9   :  { %v597_v46 = vadd.f32 %v596_v44, %v595_v41  ;;  %v598_v47 = vpop.f32.mrb[2].mxu1  ;;  %v571_v48 = vpop.f32.mrb[3].mxu0 }
  0xfa   :  { %v572_v50 = vadd.f32 %v571_v48, %v570_v45  ;;  %v599_v51 = vpop.f32.mrb[3].mxu1 }
  0xfb   :  { %v415_v52 = vadd.f32 %v597_v46, %v569_v43  ;;  %v600_v53 = vadd.f32 %v599_v51, %v598_v47 }
  0xfd   :  { %v451_v54 = vadd.f32 %v531_v49, %v415_v52  ;;  %v418_v55 = vadd.f32 %v600_v53, %v572_v50 }
  0xfe   :  { %v573_v56 = vpop.f32.mrb[4].mxu0 }
  0xff   :  { %v459_v57 = vmul.f32 0.01, %v451_v54  ;;  %v452_v58 = vadd.f32 %v531_v49, %v418_v55  ;;  %v601_v59 = vpop.f32.mrb[4].mxu1  ;;  %v574_v60 = vpop.f32.mrb[5].mxu0  ;;  %vm455_vm0 = vcmp.ge.f32.partialorder %v451_v54, 0.0 }
 0x100   :  { %v575_v61 = vadd.f32 %v574_v60, %v573_v56  ;;  %v602_v62 = vpop.f32.mrb[5].mxu1  ;;  %v576_v63 = vpop.f32.mrb[6].mxu0 }
 0x101   :  { %vm456_vm1 = vcmp.ge.f32.partialorder %v452_v58, 0.0  ;;  %v460_v0 = vmul.f32 0.01, %v452_v58  ;;  %v603_v1 = vadd.f32 %v602_v62, %v601_v59  ;;  %v604_v2 = vpop.f32.mrb[6].mxu1  ;;  %v577_v3 = vpop.f32.mrb[7].mxu0  ;;  %v463_v6 = vsel %vm455_vm0, %v451_v54, %v459_v57 }
 0x102   :  { %v578_v4 = vadd.f32 %v577_v3, %v576_v63  ;;  %v605_v5 = vpop.f32.mrb[7].mxu1 }
 0x103   :  { %v464_v7 = vsel %vm456_vm1, %v452_v58, %v460_v0  ;;  %v423_v8 = vadd.f32 %v603_v1, %v575_v61  ;;  %v606_v9 = vadd.f32 %v605_v5, %v604_v2 }
 0x104   :  { %v543_v10 = vpack.c.bf16 %v464_v7, %v463_v6 }
 0x105   :  { %v453_v11 = vadd.f32 %v531_v49, %v423_v8  ;;  %v426_v12 = vadd.f32 %v606_v9, %v578_v4 }
 0x106   :  { %544 = vst [vmem:[%s803_s3] sm:$0xff] %v543_v10  }
 0x107   :  { %v461_v13 = vmul.f32 0.01, %v453_v11  ;;  %v454_v14 = vadd.f32 %v531_v49, %v426_v12  ;;  %vm457_vm2 = vcmp.ge.f32.partialorder %v453_v11, 0.0 }
 0x109   :  { %vm458_vm3 = vcmp.ge.f32.partialorder %v454_v14, 0.0  ;;  %v462_v15 = vmul.f32 0.01, %v454_v14  ;;  %v465_v16 = vsel %vm457_vm2, %v453_v11, %v461_v13 }
 0x10b   :  { %v466_v17 = vsel %vm458_vm3, %v454_v14, %v462_v15 }
 0x10c   :  { %v548_v18 = vpack.c.bf16 %v466_v17, %v465_v16 }
 0x10e   :  { %550 = vst [vmem:[%s803_s3 + $0x8] sm:$0xff] %v548_v18  }

// kernel: encoder_forward.8
= control target key start
LH: loop header
LB: loop body
LE: loop exit
PB: predicated region body
PF: predicated region fallthrough
CT: control target
= control target key end

     0   :  { %v953_v36 = vmov 0.0   ;;  %vm954_vm0 = vmmov 0   ;;  %s1170_s1 = inlined_call_operand.vmem [shape: bf16[896,128], index: 1, kind: input, shape index: {}]   ;;  %s1171_s0 = inlined_call_operand.vmem [shape: bf16[16,896], index: 0, kind: input, shape index: {}]   ;;  %s1172_s2 = inlined_call_operand.vmem [shape: f32[1,128], index: 2, kind: input, shape index: {}]   ;;  %s1173_s3 = inlined_call_operand.vmem [shape: bf16[16,128], index: 3, kind: output, shape index: {}]  }
   0x1   :  { %v887_v0 = vld [vmem:[%s1170_s1 + $0x40] sm:$0xff]   ;;  %v891_v4 = vld [vmem:[%s1170_s1 + $0x48] sm:$0xff]   ;;  %v895_v8 = vld [vmem:[%s1170_s1 + $0x50] sm:$0xff]  }
   0x2   :  { %v888_v1 = vld [vmem:[%s1170_s1 + $0xc0] sm:$0xff]   ;;  %790 = vmatprep.subr.bf16.mxu0 %v887_v0  ;;  %v892_v5 = vld [vmem:[%s1170_s1 + $0xc8] sm:$0xff]   ;;  %v896_v9 = vld [vmem:[%s1170_s1 + $0xd0] sm:$0xff]  }
   0x3   :  { %v889_v2 = vld [vmem:[%s1170_s1] sm:$0xff]   ;;  %812 = vmatprep.subr.bf16.mxu1 %v888_v1  ;;  %v893_v6 = vld [vmem:[%s1170_s1 + $0x8] sm:$0xff]   ;;  %v897_v10 = vld [vmem:[%s1170_s1 + $0x10] sm:$0xff]  }
   0x4   :  { %v890_v3 = vld [vmem:[%s1170_s1 + $0x80] sm:$0xff]   ;;  %791 = vmatpush3.bf16.msra.mxu0 %v889_v2  ;;  %v894_v7 = vld [vmem:[%s1170_s1 + $0x88] sm:$0xff]   ;;  %v898_v11 = vld [vmem:[%s1170_s1 + $0x90] sm:$0xff]  }
   0x5   :  { %813 = vmatpush3.bf16.msra.mxu1 %v890_v3  ;;  %792 = vmatprep.subr.bf16.mxu0 %v891_v4  ;;  %v899_v12 = vld [vmem:[%s1170_s1 + $0x58] sm:$0xff]   ;;  %v903_v16 = vld [vmem:[%s1170_s1 + $0x60] sm:$0xff]   ;;  %v907_v20 = vld [vmem:[%s1170_s1 + $0x68] sm:$0xff]  }
   0x6   :  { %814 = vmatprep.subr.bf16.mxu1 %v892_v5  ;;  %v900_v13 = vld [vmem:[%s1170_s1 + $0xd8] sm:$0xff]   ;;  %v904_v17 = vld [vmem:[%s1170_s1 + $0xe0] sm:$0xff]   ;;  %v908_v21 = vld [vmem:[%s1170_s1 + $0xe8] sm:$0xff]  }
   0x7   :  { %v901_v14 = vld [vmem:[%s1170_s1 + $0x18] sm:$0xff]   ;;  %v905_v18 = vld [vmem:[%s1170_s1 + $0x20] sm:$0xff]   ;;  %v909_v22 = vld [vmem:[%s1170_s1 + $0x28] sm:$0xff]  }
   0x8   :  { %793 = vmatpush3.bf16.msra.mxu0 %v893_v6  ;;  %v902_v15 = vld [vmem:[%s1170_s1 + $0x98] sm:$0xff]   ;;  %v906_v19 = vld [vmem:[%s1170_s1 + $0xa0] sm:$0xff]   ;;  %v910_v23 = vld [vmem:[%s1170_s1 + $0xa8] sm:$0xff]  }
   0x9   :  { %815 = vmatpush3.bf16.msra.mxu1 %v894_v7  ;;  %794 = vmatprep.subr.bf16.mxu0 %v895_v8  ;;  %v911_v24 = vld [vmem:[%s1170_s1 + $0x70] sm:$0xff]   ;;  %v915_v28 = vld [vmem:[%s1170_s1 + $0x78] sm:$0xff]   ;;  %v921_v33 = vld [vmem:[%s1171_s0 + $0x4] ss:$28 sps:$4 sm:$0xff]  }
   0xa   :  { %816 = vmatprep.subr.bf16.mxu1 %v896_v9  ;;  %v912_v25 = vld [vmem:[%s1170_s1 + $0xf0] sm:$0xff]   ;;  %v916_v29 = vld [vmem:[%s1170_s1 + $0xf8] sm:$0xff]   ;;  %v922_v34 = vld [vmem:[%s1171_s0 + $0x8] ss:$28 sps:$4 sm:$0xff]   ;;  %547 = vmatprep.mubr.bf16.mxu0 %v921_v33 }
   0xb   :  { %v913_v26 = vld [vmem:[%s1170_s1 + $0x30] sm:$0xff]   ;;  %v917_v30 = vld [vmem:[%s1170_s1 + $0x38] sm:$0xff]   ;;  %v924_v35 = vld [vmem:[%s1171_s0 + $0xc] ss:$28 sps:$4 sm:$0xff]  }
   0xc   :  { %795 = vmatpush3.bf16.msra.mxu0 %v897_v10  ;;  %v914_v27 = vld [vmem:[%s1170_s1 + $0xb0] sm:$0xff]   ;;  %v918_v31 = vld [vmem:[%s1170_s1 + $0xb8] sm:$0xff]   ;;  %v925_v37 = vld [vmem:[%s1170_s1 + $0x140] sm:$0xff]   ;;  %588 = vmatprep.mubr.bf16.mxu1 %v924_v35 }
   0xd   :  { %817 = vmatpush3.bf16.msra.mxu1 %v898_v11  ;;  %796 = vmatprep.subr.bf16.mxu0 %v899_v12  ;;  %v919_v32 = vld [vmem:[%s1171_s0] ss:$28 sps:$4 sm:$0xff]   ;;  %v928_v40 = vld [vmem:[%s1170_s1 + $0x148] sm:$0xff]   ;;  %v931_v43 = vld [vmem:[%s1170_s1 + $0x150] sm:$0xff]  }
   0xe   :  { %818 = vmatprep.subr.bf16.mxu1 %v900_v13  ;;  %v926_v38 = vld [vmem:[%s1170_s1 + $0x100] sm:$0xff]   ;;  %v929_v41 = vld [vmem:[%s1170_s1 + $0x108] sm:$0xff]   ;;  %v932_v44 = vld [vmem:[%s1170_s1 + $0x110] sm:$0xff]  }
   0xf   :  { %v927_v39 = vld [vmem:[%s1170_s1 + $0x180] sm:$0xff]   ;;  %v930_v42 = vld [vmem:[%s1170_s1 + $0x188] sm:$0xff]   ;;  %v933_v45 = vld [vmem:[%s1170_s1 + $0x190] sm:$0xff]  }
  0x10   :  { %797 = vmatpush3.bf16.msra.mxu0 %v901_v14  ;;  %v934_v46 = vld [vmem:[%s1170_s1 + $0x158] sm:$0xff]   ;;  %v937_v49 = vld [vmem:[%s1170_s1 + $0x160] sm:$0xff]   ;;  %v940_v52 = vld [vmem:[%s1170_s1 + $0x168] sm:$0xff]  }
  0x11   :  { %819 = vmatpush3.bf16.msra.mxu1 %v902_v15  ;;  %798 = vmatprep.subr.bf16.mxu0 %v903_v16  ;;  %v935_v47 = vld [vmem:[%s1170_s1 + $0x118] sm:$0xff]   ;;  %v938_v50 = vld [vmem:[%s1170_s1 + $0x120] sm:$0xff]   ;;  %v941_v53 = vld [vmem:[%s1170_s1 + $0x128] sm:$0xff]  }
  0x12   :  { %820 = vmatprep.subr.bf16.mxu1 %v904_v17  ;;  %v936_v48 = vld [vmem:[%s1170_s1 + $0x198] sm:$0xff]   ;;  %v939_v51 = vld [vmem:[%s1170_s1 + $0x1a0] sm:$0xff]   ;;  %v942_v54 = vld [vmem:[%s1170_s1 + $0x1a8] sm:$0xff]  }
  0x13   :  { %v943_v55 = vld [vmem:[%s1170_s1 + $0x170] sm:$0xff]   ;;  %v946_v59 = vld [vmem:[%s1170_s1 + $0x178] sm:$0xff]  }
  0x14   :  { %799 = vmatpush3.bf16.msra.mxu0 %v905_v18  ;;  %v944_v56 = vld [vmem:[%s1170_s1 + $0x130] sm:$0xff]   ;;  %v947_v60 = vld [vmem:[%s1170_s1 + $0x138] sm:$0xff]  }
  0x15   :  { %821 = vmatpush3.bf16.msra.mxu1 %v906_v19  ;;  %800 = vmatprep.subr.bf16.mxu0 %v907_v20  ;;  %v945_v57 = vld [vmem:[%s1170_s1 + $0x1b0] sm:$0xff]   ;;  %v951_v61 = vld [vmem:[%s1170_s1 + $0x1b8] sm:$0xff]  }
  0x16   :  { %822 = vmatprep.subr.bf16.mxu1 %v908_v21  ;;  %v950_v58 = vld [vmem:[%s1171_s0 + $0x14] ss:$28 sps:$4 sm:$0xff]  }
  0x17   :  { %v948_v62 = vld [vmem:[%s1171_s0 + $0x10] ss:$28 sps:$4 sm:$0xff]   ;;  %v952_v63 = vld [vmem:[%s1171_s0 + $0x18] ss:$28 sps:$4 sm:$0xff]  }
  0x18   :  { %801 = vmatpush3.bf16.msra.mxu0 %v909_v22 }
  0x19   :  { %823 = vmatpush3.bf16.msra.mxu1 %v910_v23  ;;  %802 = vmatprep.subr.bf16.mxu0 %v911_v24 }
  0x1a   :  { %824 = vmatprep.subr.bf16.mxu1 %v912_v25  ;;  %v780_v25 = vld [vmem:[%s1172_s2] ss:$0 sm:$0xff] }
  0x1c   :  { %803 = vmatpush3.bf16.msra.mxu0 %v913_v26 }
  0x1d   :  { %825 = vmatpush3.bf16.msra.mxu1 %v914_v27  ;;  %804 = vmatprep.subr.bf16.mxu0 %v915_v28 }
  0x1e   :  { %826 = vmatprep.subr.bf16.mxu1 %v916_v29 }
  0x20   :  { %805 = vmatpush3.bf16.msra.mxu0 %v917_v30 }
  0x21   :  { %827 = vmatpush3.bf16.msra.mxu1 %v918_v31  ;;  %834 = vmatprep.subr.bf16.mxu0 %v925_v37 }
  0x22   :  { %865 = vmatprep.subr.bf16.mxu1 %v953_v36 }
  0x23   :  { %548 = vmatmul.mubr.bf16.vlgmr.msra.gmra.mrb[0].mxu0 %v919_v32 }
  0x24   :  { %589 = vmatmul.mubr.bf16.vlgmr.msra.gmra.mrb[0].mxu1 %v922_v34  ;;  %835 = vmatpush3.bf16.msra.mxu0 %v926_v38 }
  0x25   :  { %881 = vmatprep.mubr.msk.bf16.mxu1 %vm954_vm0, %v953_v36  ;;  %866 = vmatpush3.bf16.msra.mxu1 %v927_v39 }
  0x26   :  { %836 = vmatprep.subr.bf16.mxu0 %v928_v40  ;;  %867 = vmatprep.subr.bf16.mxu1 %v953_v36 }
  0x27   :  { %629 = vmatprep.mubr.bf16.mxu0 %v950_v58 }
  0x28   :  { %837 = vmatpush3.bf16.msra.mxu0 %v929_v41 }
  0x29   :  { %868 = vmatpush3.bf16.msra.mxu1 %v930_v42  ;;  %838 = vmatprep.subr.bf16.mxu0 %v931_v43 }
  0x2a   :  { %869 = vmatprep.subr.bf16.mxu1 %v953_v36 }
  0x2c   :  { %839 = vmatpush3.bf16.msra.mxu0 %v932_v44 }
  0x2d   :  { %870 = vmatpush3.bf16.msra.mxu1 %v933_v45  ;;  %840 = vmatprep.subr.bf16.mxu0 %v934_v46 }
  0x2e   :  { %871 = vmatprep.subr.bf16.mxu1 %v953_v36 }
  0x30   :  { %841 = vmatpush3.bf16.msra.mxu0 %v935_v47 }
  0x31   :  { %872 = vmatpush3.bf16.msra.mxu1 %v936_v48  ;;  %842 = vmatprep.subr.bf16.mxu0 %v937_v49 }
  0x32   :  { %873 = vmatprep.subr.bf16.mxu1 %v953_v36 }
  0x34   :  { %843 = vmatpush3.bf16.msra.mxu0 %v938_v50 }
  0x35   :  { %874 = vmatpush3.bf16.msra.mxu1 %v939_v51  ;;  %844 = vmatprep.subr.bf16.mxu0 %v940_v52 }
  0x36   :  { %875 = vmatprep.subr.bf16.mxu1 %v953_v36 }
  0x38   :  { %845 = vmatpush3.bf16.msra.mxu0 %v941_v53 }
  0x39   :  { %876 = vmatpush3.bf16.msra.mxu1 %v942_v54  ;;  %846 = vmatprep.subr.bf16.mxu0 %v943_v55 }
  0x3a   :  { %877 = vmatprep.subr.bf16.mxu1 %v953_v36 }
  0x3c   :  { %847 = vmatpush3.bf16.msra.mxu0 %v944_v56 }
  0x3d   :  { %878 = vmatpush3.bf16.msra.mxu1 %v945_v57  ;;  %848 = vmatprep.subr.bf16.mxu0 %v946_v59 }
  0x3e   :  { %879 = vmatprep.subr.bf16.mxu1 %v953_v36 }
  0x40   :  { %849 = vmatpush3.bf16.msra.mxu0 %v947_v60 }
  0x41   :  { %880 = vmatpush3.bf16.msra.mxu1 %v951_v61 }
  0x43   :  { %630 = vmatmul.mubr.bf16.vlgmr.msra.gmra.mrb[4].mxu0 %v948_v62 }
  0x44   :  { %882 = vmatmul.mubr.bf16.vlgmr.msra.gmra.mrb[4].mxu1 %v952_v63 }
  0xf6   :  { %v806_v0 = vpop.f32.mrb[0].mxu0 }
  0xf7   :  { %v828_v1 = vpop.f32.mrb[0].mxu1  ;;  %v807_v2 = vpop.f32.mrb[1].mxu0 }
  0xf8   :  { %v808_v3 = vadd.f32 %v807_v2, %v806_v0  ;;  %v829_v4 = vpop.f32.mrb[1].mxu1  ;;  %v809_v5 = vpop.f32.mrb[2].mxu0 }
  0xf9   :  { %v830_v6 = vadd.f32 %v829_v4, %v828_v1  ;;  %v831_v7 = vpop.f32.mrb[2].mxu1  ;;  %v810_v8 = vpop.f32.mrb[3].mxu0 }
  0xfa   :  { %v811_v9 = vadd.f32 %v810_v8, %v809_v5  ;;  %v832_v10 = vpop.f32.mrb[3].mxu1 }
  0xfb   :  { %v591_v11 = vadd.f32 %v830_v6, %v808_v3  ;;  %v833_v12 = vadd.f32 %v832_v10, %v831_v7 }
  0xfd   :  { %v594_v13 = vadd.f32 %v833_v12, %v811_v9 }
 0x116   :  { %v850_v14 = vpop.f32.mrb[4].mxu0 }
 0x117   :  { %v851_v15 = vpop.f32.mrb[5].mxu0  ;;  %v672_v16 = vpop.f32.mrb[4].mxu1 }
 0x118   :  { %v852_v17 = vadd.f32 %v851_v15, %v850_v14  ;;  %v853_v18 = vpop.f32.mrb[6].mxu0  ;;  %v883_v19 = vpop.f32.mrb[5].mxu1 }
 0x119   :  { %v854_v20 = vpop.f32.mrb[7].mxu0  ;;  %v675_v21 = vpop.f32.mrb[6].mxu1 }
 0x11a   :  { %v632_v22 = vadd.f32 %v852_v17, %v591_v11  ;;  %v855_v23 = vadd.f32 %v854_v20, %v853_v18  ;;  %v884_v24 = vpop.f32.mrb[7].mxu1 }
 0x11c   :  { %v673_v26 = vadd.f32 %v672_v16, %v632_v22  ;;  %v635_v27 = vadd.f32 %v855_v23, %v594_v13 }
 0x11e   :  { %v695_v28 = vadd.f32 %v780_v25, %v673_v26  ;;  %v676_v29 = vadd.f32 %v675_v21, %v635_v27 }
 0x120   :  { %v699_v30 = vmul.f32 0.01, %v695_v28  ;;  %v696_v31 = vadd.f32 %v780_v25, %v676_v29  ;;  %vm697_vm1 = vcmp.ge.f32.partialorder %v695_v28, 0.0 }
 0x122   :  { %vm698_vm2 = vcmp.ge.f32.partialorder %v696_v31, 0.0  ;;  %v700_v32 = vmul.f32 0.01, %v696_v31  ;;  %v701_v33 = vsel %vm697_vm1, %v695_v28, %v699_v30 }
 0x124   :  { %v702_v34 = vsel %vm698_vm2, %v696_v31, %v700_v32 }
 0x125   :  { %v788_v35 = vpack.c.bf16 %v702_v34, %v701_v33 }
 0x127   :  { %789 = vst [vmem:[%s1173_s3] sm:$0xff] %v788_v35  }

// kernel: encoder_forward.9
= control target key start
LH: loop header
LB: loop body
LE: loop exit
PB: predicated region body
PF: predicated region fallthrough
CT: control target
= control target key end

     0   :  { %s371_s1 = inlined_call_operand.vmem [shape: bf16[256,128], index: 1, kind: input, shape index: {}]   ;;  %s372_s0 = inlined_call_operand.vmem [shape: bf16[16,256], index: 0, kind: input, shape index: {}]   ;;  %s373_s2 = inlined_call_operand.vmem [shape: f32[1,128], index: 2, kind: input, shape index: {}]   ;;  %s374_s3 = inlined_call_operand.vmem [shape: f32[16,128], index: 3, kind: output, shape index: {}]  }
   0x1   :  { %v269_v0 = vld [vmem:[%s371_s1 + $0x40] sm:$0xff]   ;;  %v271_v2 = vld [vmem:[%s371_s1 + $0x48] sm:$0xff]   ;;  %v273_v4 = vld [vmem:[%s371_s1 + $0x50] sm:$0xff]  }
   0x2   :  { %v270_v1 = vld [vmem:[%s371_s1] sm:$0xff]   ;;  %247 = vmatprep.subr.bf16.mxu0 %v269_v0  ;;  %v272_v3 = vld [vmem:[%s371_s1 + $0x8] sm:$0xff]   ;;  %v274_v5 = vld [vmem:[%s371_s1 + $0x10] sm:$0xff]  }
   0x3   :  { %248 = vmatpush3.bf16.msra.mxu0 %v270_v1  ;;  %v275_v6 = vld [vmem:[%s371_s1 + $0x58] sm:$0xff]   ;;  %v277_v8 = vld [vmem:[%s371_s1 + $0x60] sm:$0xff]   ;;  %v279_v10 = vld [vmem:[%s371_s1 + $0x68] sm:$0xff]  }
   0x4   :  { %249 = vmatprep.subr.bf16.mxu0 %v271_v2  ;;  %v276_v7 = vld [vmem:[%s371_s1 + $0x18] sm:$0xff]   ;;  %v278_v9 = vld [vmem:[%s371_s1 + $0x20] sm:$0xff]   ;;  %v280_v12 = vld [vmem:[%s371_s1 + $0x28] sm:$0xff]  }
   0x5   :  { %v287_v11 = vld [vmem:[%s372_s0 + $0x4] ss:$8 sps:$4 sm:$0xff]   ;;  %v281_v13 = vld [vmem:[%s371_s1 + $0x70] sm:$0xff]   ;;  %v283_v15 = vld [vmem:[%s371_s1 + $0x78] sm:$0xff]  }
   0x6   :  { %195 = vmatprep.mubr.bf16.mxu0 %v287_v11  ;;  %v282_v14 = vld [vmem:[%s371_s1 + $0x30] sm:$0xff]   ;;  %v284_v16 = vld [vmem:[%s371_s1 + $0x38] sm:$0xff]   ;;  %v285_v17 = vld [vmem:[%s372_s0] ss:$8 sps:$4 sm:$0xff]  }
   0x7   :  { %250 = vmatpush3.bf16.msra.mxu0 %v272_v3  ;;  %v246_v20 = vld [vmem:[%s373_s2] ss:$0 sm:$0xff] }
   0x8   :  { %251 = vmatprep.subr.bf16.mxu0 %v273_v4 }
   0xb   :  { %252 = vmatpush3.bf16.msra.mxu0 %v274_v5 }
   0xc   :  { %253 = vmatprep.subr.bf16.mxu0 %v275_v6 }
   0xf   :  { %254 = vmatpush3.bf16.msra.mxu0 %v276_v7 }
  0x10   :  { %255 = vmatprep.subr.bf16.mxu0 %v277_v8 }
  0x13   :  { %256 = vmatpush3.bf16.msra.mxu0 %v278_v9 }
  0x14   :  { %257 = vmatprep.subr.bf16.mxu0 %v279_v10 }
  0x17   :  { %258 = vmatpush3.bf16.msra.mxu0 %v280_v12 }
  0x18   :  { %259 = vmatprep.subr.bf16.mxu0 %v281_v13 }
  0x1b   :  { %260 = vmatpush3.bf16.msra.mxu0 %v282_v14 }
  0x1c   :  { %261 = vmatprep.subr.bf16.mxu0 %v283_v15 }
  0x1f   :  { %262 = vmatpush3.bf16.msra.mxu0 %v284_v16 }
  0x22   :  { %196 = vmatmul.mubr.bf16.vlgmr.msra.gmra.mrb[0].mxu0 %v285_v17 }
  0xf5   :  { %v263_v18 = vpop.f32.mrb[0].mxu0 }
  0xf6   :  { %v264_v19 = vpop.f32.mrb[1].mxu0 }
  0xf7   :  { %v265_v21 = vadd.f32 %v264_v19, %v263_v18  ;;  %v266_v22 = vpop.f32.mrb[2].mxu0 }
  0xf8   :  { %v267_v23 = vpop.f32.mrb[3].mxu0 }
  0xf9   :  { %v220_v24 = vadd.f32 %v265_v21, %v246_v20  ;;  %v268_v25 = vadd.f32 %v267_v23, %v266_v22 }
  0xfb   :  { %222 = vst [vmem:[%s374_s3] sm:$0xff] %v220_v24  ;;  %v221_v26 = vadd.f32 %v268_v25, %v246_v20 }
  0xfd   :  { %223 = vst [vmem:[%s374_s3 + $0x8] sm:$0xff] %v221_v26 }

</bundles_post_ra>
